<compile_context>
chip_gen: v6e
topology: v6e:2x2x1
jax: 0.10.0
libtpu: 0.0.40
codegen_flags: <defaults>
</compile_context>

<pallas_src>
import functools
import math

import jax
import jax.numpy as jnp
from jax.experimental import pallas as pl
from jax.experimental.pallas import tpu as pltpu  # noqa: F401  (TPU backend assumed)

# ---------------- synthetic mini-BERT config (small shapes) -------------------
VOCAB = 128
HIDDEN = 64
N_HEADS = 4
HEAD_DIM = HIDDEN // N_HEADS
INTERMEDIATE = 128
N_LAYERS = 2
MAX_POS = 32
NUM_CLASS = 36           # CONFIG['num_class']
FC_PAD = 128             # lane-dense classifier output (sliced to NUM_CLASS outside)
INIT_RANGE = 0.02        # config.initializer_range
LN_EPS = 1e-12

BATCH = 2
SEQ = 8


# ------------------------------ fused Pallas kernel ---------------------------
def _ccf_fused_kernel(
    ids_ref, attn_bias_ref, emb_bias_ref,
    word_emb_ref, emb_ln_g_ref, emb_ln_b_ref,
    wqkv_ref, bqkv_ref, wo_ref, bo_ref, ln1_g_ref, ln1_b_ref,
    w1_ref, b1_ref, w2_ref, b2_ref, ln2_g_ref, ln2_b_ref,
    fc_w_ref, fc_b_ref,
    out_ref,
    *, batch, seq, hidden, n_heads, head_dim, n_layers, vocab, eps):
  bs = batch * seq

  def layernorm(x, g, b):
    mu = jnp.mean(x, axis=-1, keepdims=True)
    var = jnp.mean((x - mu) * (x - mu), axis=-1, keepdims=True)
    return (x - mu) * jax.lax.rsqrt(var + eps) * g + b

  # ---- embeddings: one-hot token gather on the MXU + (pos+type) bias + LN ----
  lane_iota = jax.lax.broadcasted_iota(jnp.int32, (bs, vocab), 1)
  onehot = (lane_iota == ids_ref[...]).astype(jnp.float32)            # (BS, V)
  x = jnp.dot(onehot, word_emb_ref[...], preferred_element_type=jnp.float32)
  x = x + emb_bias_ref[...]
  x = layernorm(x, emb_ln_g_ref[...], emb_ln_b_ref[...])              # (BS, H)

  attn_bias = attn_bias_ref[...]                                      # (BS, BS)

  for l in range(n_layers):
    # fused QKV projection (Q columns pre-scaled by 1/sqrt(head_dim) at init)
    qkv = jnp.dot(x, wqkv_ref[l], preferred_element_type=jnp.float32) + bqkv_ref[l]
    ctx_heads = []
    for h in range(n_heads):
      q = qkv[:, h * head_dim:(h + 1) * head_dim]                     # (BS, HD)
      k = qkv[:, hidden + h * head_dim:hidden + (h + 1) * head_dim]
      v = qkv[:, 2 * hidden + h * head_dim:2 * hidden + (h + 1) * head_dim]
      s = jax.lax.dot_general(q, k, (((1,), (1,)), ((), ())),
                              preferred_element_type=jnp.float32)     # (BS, BS)
      s = s + attn_bias                                               # pad + batch block-diag
      s = s - jnp.max(s, axis=-1, keepdims=True)
      p = jnp.exp(s)
      p = p * pl.reciprocal(jnp.sum(p, axis=-1, keepdims=True), approx=True)
      ctx_heads.append(jnp.dot(p, v, preferred_element_type=jnp.float32))
    ctx = jnp.concatenate(ctx_heads, axis=-1)                         # (BS, H)
    attn_out = jnp.dot(ctx, wo_ref[l], preferred_element_type=jnp.float32) + bo_ref[l]
    x = layernorm(x + attn_out, ln1_g_ref[l], ln1_b_ref[l])

    # TODO(synk): HF BERT default GELU is the exact erf form; tanh approximation used here.
    hmid = jnp.dot(x, w1_ref[l], preferred_element_type=jnp.float32) + b1_ref[l]
    hmid = jax.nn.gelu(hmid, approximate=True)
    ffn = jnp.dot(hmid, w2_ref[l], preferred_element_type=jnp.float32) + b2_ref[l]
    x = layernorm(x + ffn, ln2_g_ref[l], ln2_b_ref[l])

  # ---- CLS pooling (row b*seq per batch) via a tiny selection matmul ----
  sel = (jax.lax.broadcasted_iota(jnp.int32, (batch, bs), 1) ==
         jax.lax.broadcasted_iota(jnp.int32, (batch, bs), 0) * seq).astype(jnp.float32)
  cls = jnp.dot(sel, x, preferred_element_type=jnp.float32)           # (B, H)
  # TODO(synk): nn.Dropout(p=0.1) is identity in eval mode; training-mode stochastic
  #             dropout (pltpu.prng_random_bits mask) not implemented.
  logits = jnp.dot(cls, fc_w_ref[...], preferred_element_type=jnp.float32) + fc_b_ref[...]
  out_ref[...] = logits.astype(out_ref.dtype)                         # (B, FC_PAD) lane-dense


# ------------------------------ parameter init --------------------------------
def init_params(key):
  def normal(k, shape, std=INIT_RANGE):
    return std * jax.random.normal(k, shape, dtype=jnp.float32)

  keys = iter(jax.random.split(key, 256))
  scale = 1.0 / math.sqrt(HEAD_DIM)

  wqkv, wo, w1, w2 = [], [], [], []
  for _ in range(N_LAYERS):
    wq = normal(next(keys), (HIDDEN, HIDDEN))
    wk = normal(next(keys), (HIDDEN, HIDDEN))
    wv = normal(next(keys), (HIDDEN, HIDDEN))
    # fused QKV weight; attention scale folded into the Q columns
    wqkv.append(jnp.concatenate([wq * scale, wk, wv], axis=1))        # (H, 3H)
    wo.append(normal(next(keys), (HIDDEN, HIDDEN)))
    w1.append(normal(next(keys), (HIDDEN, INTERMEDIATE)))
    w2.append(normal(next(keys), (INTERMEDIATE, HIDDEN)))

  # classifier head: exactly CCFModel._init_weights(nn.Linear), padded to 128 lanes
  fc_w = normal(next(keys), (HIDDEN, NUM_CLASS))
  fc_w_pad = jnp.zeros((HIDDEN, FC_PAD), jnp.float32).at[:, :NUM_CLASS].set(fc_w)

  L = N_LAYERS
  return {
      "word_emb": normal(next(keys), (VOCAB, HIDDEN)),
      "pos_emb": normal(next(keys), (MAX_POS, HIDDEN)),
      "type_emb": normal(next(keys), (2, HIDDEN)),
      "emb_ln_g": jnp.ones((1, HIDDEN), jnp.float32),
      "emb_ln_b": jnp.zeros((1, HIDDEN), jnp.float32),
      "wqkv": jnp.stack(wqkv),                                        # (L, H, 3H)
      "bqkv": jnp.zeros((L, 1, 3 * HIDDEN), jnp.float32),
      "wo": jnp.stack(wo),
      "bo": jnp.zeros((L, 1, HIDDEN), jnp.float32),
      "ln1_g": jnp.ones((L, 1, HIDDEN), jnp.float32),
      "ln1_b": jnp.zeros((L, 1, HIDDEN), jnp.float32),
      "w1": jnp.stack(w1),
      "b1": jnp.zeros((L, 1, INTERMEDIATE), jnp.float32),
      "w2": jnp.stack(w2),
      "b2": jnp.zeros((L, 1, HIDDEN), jnp.float32),
      "ln2_g": jnp.ones((L, 1, HIDDEN), jnp.float32),
      "ln2_b": jnp.zeros((L, 1, HIDDEN), jnp.float32),
      "fc_w_pad": fc_w_pad,
      "fc_b_pad": jnp.zeros((1, FC_PAD), jnp.float32),                # bias zero per _init_weights
  }


# ------------------------------- forward pass ---------------------------------
def ccf_forward(params, ids, mask):
  B, S = ids.shape
  bs = B * S

  ids_col = ids.reshape(bs, 1).astype(jnp.int32)

  # additive attention bias: key-padding mask + batch block-diagonal separation
  row_batch = jnp.repeat(jnp.arange(B, dtype=jnp.int32), S)           # (BS,)
  allow = (row_batch[:, None] == row_batch[None, :]) & \
          (mask.reshape(bs).astype(jnp.int32)[None, :] == 1)
  attn_bias = jnp.where(allow, 0.0, -1e9).astype(jnp.float32)         # (BS, BS)

  # position + token-type(=0) embedding contribution, flattened to (BS, H)
  emb_bias = jnp.tile(params["pos_emb"][:S] + params["type_emb"][0][None, :], (B, 1))

  kernel = functools.partial(
      _ccf_fused_kernel, batch=B, seq=S, hidden=HIDDEN, n_heads=N_HEADS,
      head_dim=HEAD_DIM, n_layers=N_LAYERS, vocab=VOCAB, eps=LN_EPS)

  logits_pad = pl.pallas_call(
      kernel,
      out_shape=jax.ShapeDtypeStruct((B, FC_PAD), jnp.float32),
  )(ids_col, attn_bias, emb_bias,
    params["word_emb"], params["emb_ln_g"], params["emb_ln_b"],
    params["wqkv"], params["bqkv"], params["wo"], params["bo"],
    params["ln1_g"], params["ln1_b"],
    params["w1"], params["b1"], params["w2"], params["b2"],
    params["ln2_g"], params["ln2_b"],
    params["fc_w_pad"], params["fc_b_pad"])

  return logits_pad[:, :NUM_CLASS]


# ----------------------------------- main --------------------------------------
if __name__ == "__main__":
  key = jax.random.PRNGKey(0)
  k_param, k_ids = jax.random.split(key)

  params = init_params(k_param)
  ids = jax.random.randint(k_ids, (BATCH, SEQ), 0, VOCAB, dtype=jnp.int32)
  mask = jnp.ones((BATCH, SEQ), dtype=jnp.int32)

  logits = jax.jit(ccf_forward)(params, ids, mask)
  jax.block_until_ready(logits)
  assert logits.shape == (BATCH, NUM_CLASS)
  assert bool(jnp.all(jnp.isfinite(logits)))
  print("KERNEL_OK")
</pallas_src>

<mosaic_0001>
module attributes {stable_mosaic.version = 11 : i64} {
  func.func @_ccf_fused_kernel(%arg0: memref<16x1xi32, #tpu.memory_space<vmem>>, %arg1: memref<16x16xf32, #tpu.memory_space<vmem>>, %arg2: memref<16x64xf32, #tpu.memory_space<vmem>>, %arg3: memref<128x64xf32, #tpu.memory_space<vmem>>, %arg4: memref<1x64xf32, #tpu.memory_space<vmem>>, %arg5: memref<1x64xf32, #tpu.memory_space<vmem>>, %arg6: memref<2x64x192xf32, #tpu.memory_space<vmem>>, %arg7: memref<2x1x192xf32, #tpu.memory_space<vmem>>, %arg8: memref<2x64x64xf32, #tpu.memory_space<vmem>>, %arg9: memref<2x1x64xf32, #tpu.memory_space<vmem>>, %arg10: memref<2x1x64xf32, #tpu.memory_space<vmem>>, %arg11: memref<2x1x64xf32, #tpu.memory_space<vmem>>, %arg12: memref<2x64x128xf32, #tpu.memory_space<vmem>>, %arg13: memref<2x1x128xf32, #tpu.memory_space<vmem>>, %arg14: memref<2x128x64xf32, #tpu.memory_space<vmem>>, %arg15: memref<2x1x64xf32, #tpu.memory_space<vmem>>, %arg16: memref<2x1x64xf32, #tpu.memory_space<vmem>>, %arg17: memref<2x1x64xf32, #tpu.memory_space<vmem>>, %arg18: memref<64x128xf32, #tpu.memory_space<vmem>>, %arg19: memref<1x128xf32, #tpu.memory_space<vmem>>, %arg20: memref<2x128xf32, #tpu.memory_space<vmem>>) attributes {dimension_semantics = [], scalar_prefetch = 0 : i64, scratch_operands = 0 : i64, tpu.core_type = #tpu.core_type<tc>} {
    %0 = tpu.iota {dimensions = array<i32: 1>} : vector<16x128xi32>
    %c0 = arith.constant 0 : index
    %c0_0 = arith.constant 0 : index
    %1 = vector.load %arg0[%c0, %c0_0] : memref<16x1xi32, #tpu.memory_space<vmem>>, vector<16x1xi32>
    %2 = vector.broadcast %1 : vector<16x1xi32> to vector<16x128xi32>
    %3 = arith.cmpi eq, %0, %2 : vector<16x128xi32>
    %4 = arith.extui %3 : vector<16x128xi1> to vector<16x128xi32>
    %5 = arith.sitofp %4 : vector<16x128xi32> to vector<16x128xf32>
    %c0_1 = arith.constant 0 : index
    %c0_2 = arith.constant 0 : index
    %6 = vector.load %arg3[%c0_1, %c0_2] : memref<128x64xf32, #tpu.memory_space<vmem>>, vector<128x64xf32>
    %cst = arith.constant dense<0.000000e+00> : vector<16x64xf32>
    %7 = tpu.matmul %5, %6, %cst {dimension_numbers = #tpu.dot_dimension_numbers<[1], [0], [0], [1], [0, 0, 1, 1], [], []>} : vector<16x128xf32>, vector<128x64xf32>, vector<16x64xf32> -> vector<16x64xf32>
    %c0_3 = arith.constant 0 : index
    %c0_4 = arith.constant 0 : index
    %8 = vector.load %arg2[%c0_3, %c0_4] : memref<16x64xf32, #tpu.memory_space<vmem>>, vector<16x64xf32>
    %9 = arith.addf %7, %8 : vector<16x64xf32>
    %c0_5 = arith.constant 0 : index
    %c0_6 = arith.constant 0 : index
    %10 = vector.load %arg4[%c0_5, %c0_6] : memref<1x64xf32, #tpu.memory_space<vmem>>, vector<1x64xf32>
    %c0_7 = arith.constant 0 : index
    %c0_8 = arith.constant 0 : index
    %11 = vector.load %arg5[%c0_7, %c0_8] : memref<1x64xf32, #tpu.memory_space<vmem>>, vector<1x64xf32>
    %cst_9 = arith.constant dense<0.000000e+00> : vector<16xf32>
    %12 = vector.multi_reduction <add>, %9, %cst_9 [1] : vector<16x64xf32> to vector<16xf32>
    %13 = vector.shape_cast %12 : vector<16xf32> to vector<16x1xf32>
    %cst_10 = arith.constant 6.400000e+01 : f32
    %14 = vector.broadcast %cst_10 : f32 to vector<16x1xf32>
    %15 = arith.divf %13, %14 : vector<16x1xf32>
    %16 = vector.broadcast %15 : vector<16x1xf32> to vector<16x64xf32>
    %17 = arith.subf %9, %16 : vector<16x64xf32>
    %18 = vector.broadcast %15 : vector<16x1xf32> to vector<16x64xf32>
    %19 = arith.subf %9, %18 : vector<16x64xf32>
    %20 = arith.mulf %17, %19 : vector<16x64xf32>
    %cst_11 = arith.constant dense<0.000000e+00> : vector<16xf32>
    %21 = vector.multi_reduction <add>, %20, %cst_11 [1] : vector<16x64xf32> to vector<16xf32>
    %22 = vector.shape_cast %21 : vector<16xf32> to vector<16x1xf32>
    %cst_12 = arith.constant 6.400000e+01 : f32
    %23 = vector.broadcast %cst_12 : f32 to vector<16x1xf32>
    %24 = arith.divf %22, %23 : vector<16x1xf32>
    %25 = vector.broadcast %15 : vector<16x1xf32> to vector<16x64xf32>
    %26 = arith.subf %9, %25 : vector<16x64xf32>
    %cst_13 = arith.constant 9.99999996E-13 : f32
    %27 = vector.broadcast %cst_13 : f32 to vector<16x1xf32>
    %28 = arith.addf %24, %27 : vector<16x1xf32>
    %29 = math.rsqrt %28 : vector<16x1xf32>
    %30 = vector.broadcast %29 : vector<16x1xf32> to vector<16x64xf32>
    %31 = arith.mulf %26, %30 : vector<16x64xf32>
    %32 = vector.broadcast %10 : vector<1x64xf32> to vector<16x64xf32>
    %33 = arith.mulf %31, %32 : vector<16x64xf32>
    %34 = vector.broadcast %11 : vector<1x64xf32> to vector<16x64xf32>
    %35 = arith.addf %33, %34 : vector<16x64xf32>
    %c0_14 = arith.constant 0 : index
    %c0_15 = arith.constant 0 : index
    %36 = vector.load %arg1[%c0_14, %c0_15] : memref<16x16xf32, #tpu.memory_space<vmem>>, vector<16x16xf32>
    %c0_16 = arith.constant 0 : index
    %c0_17 = arith.constant 0 : index
    %c0_18 = arith.constant 0 : index
    %37 = vector.load %arg6[%c0_16, %c0_17, %c0_18] : memref<2x64x192xf32, #tpu.memory_space<vmem>>, vector<1x64x192xf32>
    %38 = vector.shape_cast %37 : vector<1x64x192xf32> to vector<64x192xf32>
    %cst_19 = arith.constant dense<0.000000e+00> : vector<16x192xf32>
    %39 = tpu.matmul %35, %38, %cst_19 {dimension_numbers = #tpu.dot_dimension_numbers<[1], [0], [0], [1], [0, 0, 1, 1], [], []>} : vector<16x64xf32>, vector<64x192xf32>, vector<16x192xf32> -> vector<16x192xf32>
    %c0_20 = arith.constant 0 : index
    %c0_21 = arith.constant 0 : index
    %c0_22 = arith.constant 0 : index
    %40 = vector.load %arg7[%c0_20, %c0_21, %c0_22] : memref<2x1x192xf32, #tpu.memory_space<vmem>>, vector<1x1x192xf32>
    %41 = vector.shape_cast %40 : vector<1x1x192xf32> to vector<1x192xf32>
    %42 = vector.broadcast %41 : vector<1x192xf32> to vector<16x192xf32>
    %43 = arith.addf %39, %42 : vector<16x192xf32>
    %44 = vector.extract_strided_slice %43 {offsets = [0, 0], sizes = [16, 16], strides = [1, 1]} : vector<16x192xf32> to vector<16x16xf32>
    %45 = vector.extract_strided_slice %43 {offsets = [0, 64], sizes = [16, 16], strides = [1, 1]} : vector<16x192xf32> to vector<16x16xf32>
    %46 = vector.extract_strided_slice %43 {offsets = [0, 128], sizes = [16, 16], strides = [1, 1]} : vector<16x192xf32> to vector<16x16xf32>
    %cst_23 = arith.constant dense<0.000000e+00> : vector<16x16xf32>
    %47 = tpu.matmul %44, %45, %cst_23 {dimension_numbers = #tpu.dot_dimension_numbers<[1], [1], [0], [0], [0, 0, 1, 0], [], []>} : vector<16x16xf32>, vector<16x16xf32>, vector<16x16xf32> -> vector<16x16xf32>
    %48 = arith.addf %47, %36 : vector<16x16xf32>
    %cst_24 = arith.constant dense<0xFF800000> : vector<16xf32>
    %49 = vector.multi_reduction <maximumf>, %48, %cst_24 [1] : vector<16x16xf32> to vector<16xf32>
    %50 = vector.shape_cast %49 : vector<16xf32> to vector<16x1xf32>
    %51 = vector.broadcast %50 : vector<16x1xf32> to vector<16x16xf32>
    %52 = arith.subf %48, %51 : vector<16x16xf32>
    %53 = math.exp %52 : vector<16x16xf32>
    %cst_25 = arith.constant dense<0.000000e+00> : vector<16xf32>
    %54 = vector.multi_reduction <add>, %53, %cst_25 [1] : vector<16x16xf32> to vector<16xf32>
    %55 = vector.shape_cast %54 : vector<16xf32> to vector<16x1xf32>
    %56 = tpu.reciprocal %55 {approx = true} : vector<16x1xf32> -> vector<16x1xf32>
    %57 = vector.broadcast %56 : vector<16x1xf32> to vector<16x16xf32>
    %58 = arith.mulf %53, %57 : vector<16x16xf32>
    %cst_26 = arith.constant dense<0.000000e+00> : vector<16x16xf32>
    %59 = tpu.matmul %58, %46, %cst_26 {dimension_numbers = #tpu.dot_dimension_numbers<[1], [0], [0], [1], [0, 0, 1, 1], [], []>} : vector<16x16xf32>, vector<16x16xf32>, vector<16x16xf32> -> vector<16x16xf32>
    %60 = vector.extract_strided_slice %43 {offsets = [0, 16], sizes = [16, 16], strides = [1, 1]} : vector<16x192xf32> to vector<16x16xf32>
    %61 = vector.extract_strided_slice %43 {offsets = [0, 80], sizes = [16, 16], strides = [1, 1]} : vector<16x192xf32> to vector<16x16xf32>
    %62 = vector.extract_strided_slice %43 {offsets = [0, 144], sizes = [16, 16], strides = [1, 1]} : vector<16x192xf32> to vector<16x16xf32>
    %cst_27 = arith.constant dense<0.000000e+00> : vector<16x16xf32>
    %63 = tpu.matmul %60, %61, %cst_27 {dimension_numbers = #tpu.dot_dimension_numbers<[1], [1], [0], [0], [0, 0, 1, 0], [], []>} : vector<16x16xf32>, vector<16x16xf32>, vector<16x16xf32> -> vector<16x16xf32>
    %64 = arith.addf %63, %36 : vector<16x16xf32>
    %cst_28 = arith.constant dense<0xFF800000> : vector<16xf32>
    %65 = vector.multi_reduction <maximumf>, %64, %cst_28 [1] : vector<16x16xf32> to vector<16xf32>
    %66 = vector.shape_cast %65 : vector<16xf32> to vector<16x1xf32>
    %67 = vector.broadcast %66 : vector<16x1xf32> to vector<16x16xf32>
    %68 = arith.subf %64, %67 : vector<16x16xf32>
    %69 = math.exp %68 : vector<16x16xf32>
    %cst_29 = arith.constant dense<0.000000e+00> : vector<16xf32>
    %70 = vector.multi_reduction <add>, %69, %cst_29 [1] : vector<16x16xf32> to vector<16xf32>
    %71 = vector.shape_cast %70 : vector<16xf32> to vector<16x1xf32>
    %72 = tpu.reciprocal %71 {approx = true} : vector<16x1xf32> -> vector<16x1xf32>
    %73 = vector.broadcast %72 : vector<16x1xf32> to vector<16x16xf32>
    %74 = arith.mulf %69, %73 : vector<16x16xf32>
    %cst_30 = arith.constant dense<0.000000e+00> : vector<16x16xf32>
    %75 = tpu.matmul %74, %62, %cst_30 {dimension_numbers = #tpu.dot_dimension_numbers<[1], [0], [0], [1], [0, 0, 1, 1], [], []>} : vector<16x16xf32>, vector<16x16xf32>, vector<16x16xf32> -> vector<16x16xf32>
    %76 = vector.extract_strided_slice %43 {offsets = [0, 32], sizes = [16, 16], strides = [1, 1]} : vector<16x192xf32> to vector<16x16xf32>
    %77 = vector.extract_strided_slice %43 {offsets = [0, 96], sizes = [16, 16], strides = [1, 1]} : vector<16x192xf32> to vector<16x16xf32>
    %78 = vector.extract_strided_slice %43 {offsets = [0, 160], sizes = [16, 16], strides = [1, 1]} : vector<16x192xf32> to vector<16x16xf32>
    %cst_31 = arith.constant dense<0.000000e+00> : vector<16x16xf32>
    %79 = tpu.matmul %76, %77, %cst_31 {dimension_numbers = #tpu.dot_dimension_numbers<[1], [1], [0], [0], [0, 0, 1, 0], [], []>} : vector<16x16xf32>, vector<16x16xf32>, vector<16x16xf32> -> vector<16x16xf32>
    %80 = arith.addf %79, %36 : vector<16x16xf32>
    %cst_32 = arith.constant dense<0xFF800000> : vector<16xf32>
    %81 = vector.multi_reduction <maximumf>, %80, %cst_32 [1] : vector<16x16xf32> to vector<16xf32>
    %82 = vector.shape_cast %81 : vector<16xf32> to vector<16x1xf32>
    %83 = vector.broadcast %82 : vector<16x1xf32> to vector<16x16xf32>
    %84 = arith.subf %80, %83 : vector<16x16xf32>
    %85 = math.exp %84 : vector<16x16xf32>
    %cst_33 = arith.constant dense<0.000000e+00> : vector<16xf32>
    %86 = vector.multi_reduction <add>, %85, %cst_33 [1] : vector<16x16xf32> to vector<16xf32>
    %87 = vector.shape_cast %86 : vector<16xf32> to vector<16x1xf32>
    %88 = tpu.reciprocal %87 {approx = true} : vector<16x1xf32> -> vector<16x1xf32>
    %89 = vector.broadcast %88 : vector<16x1xf32> to vector<16x16xf32>
    %90 = arith.mulf %85, %89 : vector<16x16xf32>
    %cst_34 = arith.constant dense<0.000000e+00> : vector<16x16xf32>
    %91 = tpu.matmul %90, %78, %cst_34 {dimension_numbers = #tpu.dot_dimension_numbers<[1], [0], [0], [1], [0, 0, 1, 1], [], []>} : vector<16x16xf32>, vector<16x16xf32>, vector<16x16xf32> -> vector<16x16xf32>
    %92 = vector.extract_strided_slice %43 {offsets = [0, 48], sizes = [16, 16], strides = [1, 1]} : vector<16x192xf32> to vector<16x16xf32>
    %93 = vector.extract_strided_slice %43 {offsets = [0, 112], sizes = [16, 16], strides = [1, 1]} : vector<16x192xf32> to vector<16x16xf32>
    %94 = vector.extract_strided_slice %43 {offsets = [0, 176], sizes = [16, 16], strides = [1, 1]} : vector<16x192xf32> to vector<16x16xf32>
    %cst_35 = arith.constant dense<0.000000e+00> : vector<16x16xf32>
    %95 = tpu.matmul %92, %93, %cst_35 {dimension_numbers = #tpu.dot_dimension_numbers<[1], [1], [0], [0], [0, 0, 1, 0], [], []>} : vector<16x16xf32>, vector<16x16xf32>, vector<16x16xf32> -> vector<16x16xf32>
    %96 = arith.addf %95, %36 : vector<16x16xf32>
    %cst_36 = arith.constant dense<0xFF800000> : vector<16xf32>
    %97 = vector.multi_reduction <maximumf>, %96, %cst_36 [1] : vector<16x16xf32> to vector<16xf32>
    %98 = vector.shape_cast %97 : vector<16xf32> to vector<16x1xf32>
    %99 = vector.broadcast %98 : vector<16x1xf32> to vector<16x16xf32>
    %100 = arith.subf %96, %99 : vector<16x16xf32>
    %101 = math.exp %100 : vector<16x16xf32>
    %cst_37 = arith.constant dense<0.000000e+00> : vector<16xf32>
    %102 = vector.multi_reduction <add>, %101, %cst_37 [1] : vector<16x16xf32> to vector<16xf32>
    %103 = vector.shape_cast %102 : vector<16xf32> to vector<16x1xf32>
    %104 = tpu.reciprocal %103 {approx = true} : vector<16x1xf32> -> vector<16x1xf32>
    %105 = vector.broadcast %104 : vector<16x1xf32> to vector<16x16xf32>
    %106 = arith.mulf %101, %105 : vector<16x16xf32>
    %cst_38 = arith.constant dense<0.000000e+00> : vector<16x16xf32>
    %107 = tpu.matmul %106, %94, %cst_38 {dimension_numbers = #tpu.dot_dimension_numbers<[1], [0], [0], [1], [0, 0, 1, 1], [], []>} : vector<16x16xf32>, vector<16x16xf32>, vector<16x16xf32> -> vector<16x16xf32>
    %108 = tpu.concatenate %59, %75, %91, %107 in 1 : vector<16x16xf32>, vector<16x16xf32>, vector<16x16xf32>, vector<16x16xf32> -> vector<16x64xf32>
    %c0_39 = arith.constant 0 : index
    %c0_40 = arith.constant 0 : index
    %c0_41 = arith.constant 0 : index
    %109 = vector.load %arg8[%c0_39, %c0_40, %c0_41] : memref<2x64x64xf32, #tpu.memory_space<vmem>>, vector<1x64x64xf32>
    %110 = vector.shape_cast %109 : vector<1x64x64xf32> to vector<64x64xf32>
    %cst_42 = arith.constant dense<0.000000e+00> : vector<16x64xf32>
    %111 = tpu.matmul %108, %110, %cst_42 {dimension_numbers = #tpu.dot_dimension_numbers<[1], [0], [0], [1], [0, 0, 1, 1], [], []>} : vector<16x64xf32>, vector<64x64xf32>, vector<16x64xf32> -> vector<16x64xf32>
    %c0_43 = arith.constant 0 : index
    %c0_44 = arith.constant 0 : index
    %c0_45 = arith.constant 0 : index
    %112 = vector.load %arg9[%c0_43, %c0_44, %c0_45] : memref<2x1x64xf32, #tpu.memory_space<vmem>>, vector<1x1x64xf32>
    %113 = vector.shape_cast %112 : vector<1x1x64xf32> to vector<1x64xf32>
    %114 = vector.broadcast %113 : vector<1x64xf32> to vector<16x64xf32>
    %115 = arith.addf %111, %114 : vector<16x64xf32>
    %116 = arith.addf %35, %115 : vector<16x64xf32>
    %c0_46 = arith.constant 0 : index
    %c0_47 = arith.constant 0 : index
    %c0_48 = arith.constant 0 : index
    %117 = vector.load %arg10[%c0_46, %c0_47, %c0_48] : memref<2x1x64xf32, #tpu.memory_space<vmem>>, vector<1x1x64xf32>
    %118 = vector.shape_cast %117 : vector<1x1x64xf32> to vector<1x64xf32>
    %c0_49 = arith.constant 0 : index
    %c0_50 = arith.constant 0 : index
    %c0_51 = arith.constant 0 : index
    %119 = vector.load %arg11[%c0_49, %c0_50, %c0_51] : memref<2x1x64xf32, #tpu.memory_space<vmem>>, vector<1x1x64xf32>
    %120 = vector.shape_cast %119 : vector<1x1x64xf32> to vector<1x64xf32>
    %cst_52 = arith.constant dense<0.000000e+00> : vector<16xf32>
    %121 = vector.multi_reduction <add>, %116, %cst_52 [1] : vector<16x64xf32> to vector<16xf32>
    %122 = vector.shape_cast %121 : vector<16xf32> to vector<16x1xf32>
    %cst_53 = arith.constant 6.400000e+01 : f32
    %123 = vector.broadcast %cst_53 : f32 to vector<16x1xf32>
    %124 = arith.divf %122, %123 : vector<16x1xf32>
    %125 = vector.broadcast %124 : vector<16x1xf32> to vector<16x64xf32>
    %126 = arith.subf %116, %125 : vector<16x64xf32>
    %127 = vector.broadcast %124 : vector<16x1xf32> to vector<16x64xf32>
    %128 = arith.subf %116, %127 : vector<16x64xf32>
    %129 = arith.mulf %126, %128 : vector<16x64xf32>
    %cst_54 = arith.constant dense<0.000000e+00> : vector<16xf32>
    %130 = vector.multi_reduction <add>, %129, %cst_54 [1] : vector<16x64xf32> to vector<16xf32>
    %131 = vector.shape_cast %130 : vector<16xf32> to vector<16x1xf32>
    %cst_55 = arith.constant 6.400000e+01 : f32
    %132 = vector.broadcast %cst_55 : f32 to vector<16x1xf32>
    %133 = arith.divf %131, %132 : vector<16x1xf32>
    %134 = vector.broadcast %124 : vector<16x1xf32> to vector<16x64xf32>
    %135 = arith.subf %116, %134 : vector<16x64xf32>
    %cst_56 = arith.constant 9.99999996E-13 : f32
    %136 = vector.broadcast %cst_56 : f32 to vector<16x1xf32>
    %137 = arith.addf %133, %136 : vector<16x1xf32>
    %138 = math.rsqrt %137 : vector<16x1xf32>
    %139 = vector.broadcast %138 : vector<16x1xf32> to vector<16x64xf32>
    %140 = arith.mulf %135, %139 : vector<16x64xf32>
    %141 = vector.broadcast %118 : vector<1x64xf32> to vector<16x64xf32>
    %142 = arith.mulf %140, %141 : vector<16x64xf32>
    %143 = vector.broadcast %120 : vector<1x64xf32> to vector<16x64xf32>
    %144 = arith.addf %142, %143 : vector<16x64xf32>
    %c0_57 = arith.constant 0 : index
    %c0_58 = arith.constant 0 : index
    %c0_59 = arith.constant 0 : index
    %145 = vector.load %arg12[%c0_57, %c0_58, %c0_59] : memref<2x64x128xf32, #tpu.memory_space<vmem>>, vector<1x64x128xf32>
    %146 = vector.shape_cast %145 : vector<1x64x128xf32> to vector<64x128xf32>
    %cst_60 = arith.constant dense<0.000000e+00> : vector<16x128xf32>
    %147 = tpu.matmul %144, %146, %cst_60 {dimension_numbers = #tpu.dot_dimension_numbers<[1], [0], [0], [1], [0, 0, 1, 1], [], []>} : vector<16x64xf32>, vector<64x128xf32>, vector<16x128xf32> -> vector<16x128xf32>
    %c0_61 = arith.constant 0 : index
    %c0_62 = arith.constant 0 : index
    %c0_63 = arith.constant 0 : index
    %148 = vector.load %arg13[%c0_61, %c0_62, %c0_63] : memref<2x1x128xf32, #tpu.memory_space<vmem>>, vector<1x1x128xf32>
    %149 = vector.shape_cast %148 : vector<1x1x128xf32> to vector<1x128xf32>
    %150 = vector.broadcast %149 : vector<1x128xf32> to vector<16x128xf32>
    %151 = arith.addf %147, %150 : vector<16x128xf32>
    %152 = arith.mulf %151, %151 : vector<16x128xf32>
    %153 = arith.mulf %151, %152 : vector<16x128xf32>
    %cst_64 = arith.constant 4.471500e-02 : f32
    %154 = vector.broadcast %cst_64 : f32 to vector<16x128xf32>
    %155 = arith.mulf %154, %153 : vector<16x128xf32>
    %156 = arith.addf %151, %155 : vector<16x128xf32>
    %cst_65 = arith.constant 0.797884583 : f32
    %157 = vector.broadcast %cst_65 : f32 to vector<16x128xf32>
    %158 = arith.mulf %157, %156 : vector<16x128xf32>
    %159 = math.tanh %158 : vector<16x128xf32>
    %cst_66 = arith.constant 1.000000e+00 : f32
    %160 = vector.broadcast %cst_66 : f32 to vector<16x128xf32>
    %161 = arith.addf %160, %159 : vector<16x128xf32>
    %cst_67 = arith.constant 5.000000e-01 : f32
    %162 = vector.broadcast %cst_67 : f32 to vector<16x128xf32>
    %163 = arith.mulf %162, %161 : vector<16x128xf32>
    %164 = arith.mulf %151, %163 : vector<16x128xf32>
    %c0_68 = arith.constant 0 : index
    %c0_69 = arith.constant 0 : index
    %c0_70 = arith.constant 0 : index
    %165 = vector.load %arg14[%c0_68, %c0_69, %c0_70] : memref<2x128x64xf32, #tpu.memory_space<vmem>>, vector<1x128x64xf32>
    %166 = vector.shape_cast %165 : vector<1x128x64xf32> to vector<128x64xf32>
    %cst_71 = arith.constant dense<0.000000e+00> : vector<16x64xf32>
    %167 = tpu.matmul %164, %166, %cst_71 {dimension_numbers = #tpu.dot_dimension_numbers<[1], [0], [0], [1], [0, 0, 1, 1], [], []>} : vector<16x128xf32>, vector<128x64xf32>, vector<16x64xf32> -> vector<16x64xf32>
    %c0_72 = arith.constant 0 : index
    %c0_73 = arith.constant 0 : index
    %c0_74 = arith.constant 0 : index
    %168 = vector.load %arg15[%c0_72, %c0_73, %c0_74] : memref<2x1x64xf32, #tpu.memory_space<vmem>>, vector<1x1x64xf32>
    %169 = vector.shape_cast %168 : vector<1x1x64xf32> to vector<1x64xf32>
    %170 = vector.broadcast %169 : vector<1x64xf32> to vector<16x64xf32>
    %171 = arith.addf %167, %170 : vector<16x64xf32>
    %172 = arith.addf %144, %171 : vector<16x64xf32>
    %c0_75 = arith.constant 0 : index
    %c0_76 = arith.constant 0 : index
    %c0_77 = arith.constant 0 : index
    %173 = vector.load %arg16[%c0_75, %c0_76, %c0_77] : memref<2x1x64xf32, #tpu.memory_space<vmem>>, vector<1x1x64xf32>
    %174 = vector.shape_cast %173 : vector<1x1x64xf32> to vector<1x64xf32>
    %c0_78 = arith.constant 0 : index
    %c0_79 = arith.constant 0 : index
    %c0_80 = arith.constant 0 : index
    %175 = vector.load %arg17[%c0_78, %c0_79, %c0_80] : memref<2x1x64xf32, #tpu.memory_space<vmem>>, vector<1x1x64xf32>
    %176 = vector.shape_cast %175 : vector<1x1x64xf32> to vector<1x64xf32>
    %cst_81 = arith.constant dense<0.000000e+00> : vector<16xf32>
    %177 = vector.multi_reduction <add>, %172, %cst_81 [1] : vector<16x64xf32> to vector<16xf32>
    %178 = vector.shape_cast %177 : vector<16xf32> to vector<16x1xf32>
    %cst_82 = arith.constant 6.400000e+01 : f32
    %179 = vector.broadcast %cst_82 : f32 to vector<16x1xf32>
    %180 = arith.divf %178, %179 : vector<16x1xf32>
    %181 = vector.broadcast %180 : vector<16x1xf32> to vector<16x64xf32>
    %182 = arith.subf %172, %181 : vector<16x64xf32>
    %183 = vector.broadcast %180 : vector<16x1xf32> to vector<16x64xf32>
    %184 = arith.subf %172, %183 : vector<16x64xf32>
    %185 = arith.mulf %182, %184 : vector<16x64xf32>
    %cst_83 = arith.constant dense<0.000000e+00> : vector<16xf32>
    %186 = vector.multi_reduction <add>, %185, %cst_83 [1] : vector<16x64xf32> to vector<16xf32>
    %187 = vector.shape_cast %186 : vector<16xf32> to vector<16x1xf32>
    %cst_84 = arith.constant 6.400000e+01 : f32
    %188 = vector.broadcast %cst_84 : f32 to vector<16x1xf32>
    %189 = arith.divf %187, %188 : vector<16x1xf32>
    %190 = vector.broadcast %180 : vector<16x1xf32> to vector<16x64xf32>
    %191 = arith.subf %172, %190 : vector<16x64xf32>
    %cst_85 = arith.constant 9.99999996E-13 : f32
    %192 = vector.broadcast %cst_85 : f32 to vector<16x1xf32>
    %193 = arith.addf %189, %192 : vector<16x1xf32>
    %194 = math.rsqrt %193 : vector<16x1xf32>
    %195 = vector.broadcast %194 : vector<16x1xf32> to vector<16x64xf32>
    %196 = arith.mulf %191, %195 : vector<16x64xf32>
    %197 = vector.broadcast %174 : vector<1x64xf32> to vector<16x64xf32>
    %198 = arith.mulf %196, %197 : vector<16x64xf32>
    %199 = vector.broadcast %176 : vector<1x64xf32> to vector<16x64xf32>
    %200 = arith.addf %198, %199 : vector<16x64xf32>
    %c1 = arith.constant 1 : index
    %c0_86 = arith.constant 0 : index
    %c0_87 = arith.constant 0 : index
    %201 = vector.load %arg6[%c1, %c0_86, %c0_87] : memref<2x64x192xf32, #tpu.memory_space<vmem>>, vector<1x64x192xf32>
    %202 = vector.shape_cast %201 : vector<1x64x192xf32> to vector<64x192xf32>
    %cst_88 = arith.constant dense<0.000000e+00> : vector<16x192xf32>
    %203 = tpu.matmul %200, %202, %cst_88 {dimension_numbers = #tpu.dot_dimension_numbers<[1], [0], [0], [1], [0, 0, 1, 1], [], []>} : vector<16x64xf32>, vector<64x192xf32>, vector<16x192xf32> -> vector<16x192xf32>
    %c1_89 = arith.constant 1 : index
    %c0_90 = arith.constant 0 : index
    %c0_91 = arith.constant 0 : index
    %204 = vector.load %arg7[%c1_89, %c0_90, %c0_91] : memref<2x1x192xf32, #tpu.memory_space<vmem>>, vector<1x1x192xf32>
    %205 = vector.shape_cast %204 : vector<1x1x192xf32> to vector<1x192xf32>
    %206 = vector.broadcast %205 : vector<1x192xf32> to vector<16x192xf32>
    %207 = arith.addf %203, %206 : vector<16x192xf32>
    %208 = vector.extract_strided_slice %207 {offsets = [0, 0], sizes = [16, 16], strides = [1, 1]} : vector<16x192xf32> to vector<16x16xf32>
    %209 = vector.extract_strided_slice %207 {offsets = [0, 64], sizes = [16, 16], strides = [1, 1]} : vector<16x192xf32> to vector<16x16xf32>
    %210 = vector.extract_strided_slice %207 {offsets = [0, 128], sizes = [16, 16], strides = [1, 1]} : vector<16x192xf32> to vector<16x16xf32>
    %cst_92 = arith.constant dense<0.000000e+00> : vector<16x16xf32>
    %211 = tpu.matmul %208, %209, %cst_92 {dimension_numbers = #tpu.dot_dimension_numbers<[1], [1], [0], [0], [0, 0, 1, 0], [], []>} : vector<16x16xf32>, vector<16x16xf32>, vector<16x16xf32> -> vector<16x16xf32>
    %212 = arith.addf %211, %36 : vector<16x16xf32>
    %cst_93 = arith.constant dense<0xFF800000> : vector<16xf32>
    %213 = vector.multi_reduction <maximumf>, %212, %cst_93 [1] : vector<16x16xf32> to vector<16xf32>
    %214 = vector.shape_cast %213 : vector<16xf32> to vector<16x1xf32>
    %215 = vector.broadcast %214 : vector<16x1xf32> to vector<16x16xf32>
    %216 = arith.subf %212, %215 : vector<16x16xf32>
    %217 = math.exp %216 : vector<16x16xf32>
    %cst_94 = arith.constant dense<0.000000e+00> : vector<16xf32>
    %218 = vector.multi_reduction <add>, %217, %cst_94 [1] : vector<16x16xf32> to vector<16xf32>
    %219 = vector.shape_cast %218 : vector<16xf32> to vector<16x1xf32>
    %220 = tpu.reciprocal %219 {approx = true} : vector<16x1xf32> -> vector<16x1xf32>
    %221 = vector.broadcast %220 : vector<16x1xf32> to vector<16x16xf32>
    %222 = arith.mulf %217, %221 : vector<16x16xf32>
    %cst_95 = arith.constant dense<0.000000e+00> : vector<16x16xf32>
    %223 = tpu.matmul %222, %210, %cst_95 {dimension_numbers = #tpu.dot_dimension_numbers<[1], [0], [0], [1], [0, 0, 1, 1], [], []>} : vector<16x16xf32>, vector<16x16xf32>, vector<16x16xf32> -> vector<16x16xf32>
    %224 = vector.extract_strided_slice %207 {offsets = [0, 16], sizes = [16, 16], strides = [1, 1]} : vector<16x192xf32> to vector<16x16xf32>
    %225 = vector.extract_strided_slice %207 {offsets = [0, 80], sizes = [16, 16], strides = [1, 1]} : vector<16x192xf32> to vector<16x16xf32>
    %226 = vector.extract_strided_slice %207 {offsets = [0, 144], sizes = [16, 16], strides = [1, 1]} : vector<16x192xf32> to vector<16x16xf32>
    %cst_96 = arith.constant dense<0.000000e+00> : vector<16x16xf32>
    %227 = tpu.matmul %224, %225, %cst_96 {dimension_numbers = #tpu.dot_dimension_numbers<[1], [1], [0], [0], [0, 0, 1, 0], [], []>} : vector<16x16xf32>, vector<16x16xf32>, vector<16x16xf32> -> vector<16x16xf32>
    %228 = arith.addf %227, %36 : vector<16x16xf32>
    %cst_97 = arith.constant dense<0xFF800000> : vector<16xf32>
    %229 = vector.multi_reduction <maximumf>, %228, %cst_97 [1] : vector<16x16xf32> to vector<16xf32>
    %230 = vector.shape_cast %229 : vector<16xf32> to vector<16x1xf32>
    %231 = vector.broadcast %230 : vector<16x1xf32> to vector<16x16xf32>
    %232 = arith.subf %228, %231 : vector<16x16xf32>
    %233 = math.exp %232 : vector<16x16xf32>
    %cst_98 = arith.constant dense<0.000000e+00> : vector<16xf32>
    %234 = vector.multi_reduction <add>, %233, %cst_98 [1] : vector<16x16xf32> to vector<16xf32>
    %235 = vector.shape_cast %234 : vector<16xf32> to vector<16x1xf32>
    %236 = tpu.reciprocal %235 {approx = true} : vector<16x1xf32> -> vector<16x1xf32>
    %237 = vector.broadcast %236 : vector<16x1xf32> to vector<16x16xf32>
    %238 = arith.mulf %233, %237 : vector<16x16xf32>
    %cst_99 = arith.constant dense<0.000000e+00> : vector<16x16xf32>
    %239 = tpu.matmul %238, %226, %cst_99 {dimension_numbers = #tpu.dot_dimension_numbers<[1], [0], [0], [1], [0, 0, 1, 1], [], []>} : vector<16x16xf32>, vector<16x16xf32>, vector<16x16xf32> -> vector<16x16xf32>
    %240 = vector.extract_strided_slice %207 {offsets = [0, 32], sizes = [16, 16], strides = [1, 1]} : vector<16x192xf32> to vector<16x16xf32>
    %241 = vector.extract_strided_slice %207 {offsets = [0, 96], sizes = [16, 16], strides = [1, 1]} : vector<16x192xf32> to vector<16x16xf32>
    %242 = vector.extract_strided_slice %207 {offsets = [0, 160], sizes = [16, 16], strides = [1, 1]} : vector<16x192xf32> to vector<16x16xf32>
    %cst_100 = arith.constant dense<0.000000e+00> : vector<16x16xf32>
    %243 = tpu.matmul %240, %241, %cst_100 {dimension_numbers = #tpu.dot_dimension_numbers<[1], [1], [0], [0], [0, 0, 1, 0], [], []>} : vector<16x16xf32>, vector<16x16xf32>, vector<16x16xf32> -> vector<16x16xf32>
    %244 = arith.addf %243, %36 : vector<16x16xf32>
    %cst_101 = arith.constant dense<0xFF800000> : vector<16xf32>
    %245 = vector.multi_reduction <maximumf>, %244, %cst_101 [1] : vector<16x16xf32> to vector<16xf32>
    %246 = vector.shape_cast %245 : vector<16xf32> to vector<16x1xf32>
    %247 = vector.broadcast %246 : vector<16x1xf32> to vector<16x16xf32>
    %248 = arith.subf %244, %247 : vector<16x16xf32>
    %249 = math.exp %248 : vector<16x16xf32>
    %cst_102 = arith.constant dense<0.000000e+00> : vector<16xf32>
    %250 = vector.multi_reduction <add>, %249, %cst_102 [1] : vector<16x16xf32> to vector<16xf32>
    %251 = vector.shape_cast %250 : vector<16xf32> to vector<16x1xf32>
    %252 = tpu.reciprocal %251 {approx = true} : vector<16x1xf32> -> vector<16x1xf32>
    %253 = vector.broadcast %252 : vector<16x1xf32> to vector<16x16xf32>
    %254 = arith.mulf %249, %253 : vector<16x16xf32>
    %cst_103 = arith.constant dense<0.000000e+00> : vector<16x16xf32>
    %255 = tpu.matmul %254, %242, %cst_103 {dimension_numbers = #tpu.dot_dimension_numbers<[1], [0], [0], [1], [0, 0, 1, 1], [], []>} : vector<16x16xf32>, vector<16x16xf32>, vector<16x16xf32> -> vector<16x16xf32>
    %256 = vector.extract_strided_slice %207 {offsets = [0, 48], sizes = [16, 16], strides = [1, 1]} : vector<16x192xf32> to vector<16x16xf32>
    %257 = vector.extract_strided_slice %207 {offsets = [0, 112], sizes = [16, 16], strides = [1, 1]} : vector<16x192xf32> to vector<16x16xf32>
    %258 = vector.extract_strided_slice %207 {offsets = [0, 176], sizes = [16, 16], strides = [1, 1]} : vector<16x192xf32> to vector<16x16xf32>
    %cst_104 = arith.constant dense<0.000000e+00> : vector<16x16xf32>
    %259 = tpu.matmul %256, %257, %cst_104 {dimension_numbers = #tpu.dot_dimension_numbers<[1], [1], [0], [0], [0, 0, 1, 0], [], []>} : vector<16x16xf32>, vector<16x16xf32>, vector<16x16xf32> -> vector<16x16xf32>
    %260 = arith.addf %259, %36 : vector<16x16xf32>
    %cst_105 = arith.constant dense<0xFF800000> : vector<16xf32>
    %261 = vector.multi_reduction <maximumf>, %260, %cst_105 [1] : vector<16x16xf32> to vector<16xf32>
    %262 = vector.shape_cast %261 : vector<16xf32> to vector<16x1xf32>
    %263 = vector.broadcast %262 : vector<16x1xf32> to vector<16x16xf32>
    %264 = arith.subf %260, %263 : vector<16x16xf32>
    %265 = math.exp %264 : vector<16x16xf32>
    %cst_106 = arith.constant dense<0.000000e+00> : vector<16xf32>
    %266 = vector.multi_reduction <add>, %265, %cst_106 [1] : vector<16x16xf32> to vector<16xf32>
    %267 = vector.shape_cast %266 : vector<16xf32> to vector<16x1xf32>
    %268 = tpu.reciprocal %267 {approx = true} : vector<16x1xf32> -> vector<16x1xf32>
    %269 = vector.broadcast %268 : vector<16x1xf32> to vector<16x16xf32>
    %270 = arith.mulf %265, %269 : vector<16x16xf32>
    %cst_107 = arith.constant dense<0.000000e+00> : vector<16x16xf32>
    %271 = tpu.matmul %270, %258, %cst_107 {dimension_numbers = #tpu.dot_dimension_numbers<[1], [0], [0], [1], [0, 0, 1, 1], [], []>} : vector<16x16xf32>, vector<16x16xf32>, vector<16x16xf32> -> vector<16x16xf32>
    %272 = tpu.concatenate %223, %239, %255, %271 in 1 : vector<16x16xf32>, vector<16x16xf32>, vector<16x16xf32>, vector<16x16xf32> -> vector<16x64xf32>
    %c1_108 = arith.constant 1 : index
    %c0_109 = arith.constant 0 : index
    %c0_110 = arith.constant 0 : index
    %273 = vector.load %arg8[%c1_108, %c0_109, %c0_110] : memref<2x64x64xf32, #tpu.memory_space<vmem>>, vector<1x64x64xf32>
    %274 = vector.shape_cast %273 : vector<1x64x64xf32> to vector<64x64xf32>
    %cst_111 = arith.constant dense<0.000000e+00> : vector<16x64xf32>
    %275 = tpu.matmul %272, %274, %cst_111 {dimension_numbers = #tpu.dot_dimension_numbers<[1], [0], [0], [1], [0, 0, 1, 1], [], []>} : vector<16x64xf32>, vector<64x64xf32>, vector<16x64xf32> -> vector<16x64xf32>
    %c1_112 = arith.constant 1 : index
    %c0_113 = arith.constant 0 : index
    %c0_114 = arith.constant 0 : index
    %276 = vector.load %arg9[%c1_112, %c0_113, %c0_114] : memref<2x1x64xf32, #tpu.memory_space<vmem>>, vector<1x1x64xf32>
    %277 = vector.shape_cast %276 : vector<1x1x64xf32> to vector<1x64xf32>
    %278 = vector.broadcast %277 : vector<1x64xf32> to vector<16x64xf32>
    %279 = arith.addf %275, %278 : vector<16x64xf32>
    %280 = arith.addf %200, %279 : vector<16x64xf32>
    %c1_115 = arith.constant 1 : index
    %c0_116 = arith.constant 0 : index
    %c0_117 = arith.constant 0 : index
    %281 = vector.load %arg10[%c1_115, %c0_116, %c0_117] : memref<2x1x64xf32, #tpu.memory_space<vmem>>, vector<1x1x64xf32>
    %282 = vector.shape_cast %281 : vector<1x1x64xf32> to vector<1x64xf32>
    %c1_118 = arith.constant 1 : index
    %c0_119 = arith.constant 0 : index
    %c0_120 = arith.constant 0 : index
    %283 = vector.load %arg11[%c1_118, %c0_119, %c0_120] : memref<2x1x64xf32, #tpu.memory_space<vmem>>, vector<1x1x64xf32>
    %284 = vector.shape_cast %283 : vector<1x1x64xf32> to vector<1x64xf32>
    %cst_121 = arith.constant dense<0.000000e+00> : vector<16xf32>
    %285 = vector.multi_reduction <add>, %280, %cst_121 [1] : vector<16x64xf32> to vector<16xf32>
    %286 = vector.shape_cast %285 : vector<16xf32> to vector<16x1xf32>
    %cst_122 = arith.constant 6.400000e+01 : f32
    %287 = vector.broadcast %cst_122 : f32 to vector<16x1xf32>
    %288 = arith.divf %286, %287 : vector<16x1xf32>
    %289 = vector.broadcast %288 : vector<16x1xf32> to vector<16x64xf32>
    %290 = arith.subf %280, %289 : vector<16x64xf32>
    %291 = vector.broadcast %288 : vector<16x1xf32> to vector<16x64xf32>
    %292 = arith.subf %280, %291 : vector<16x64xf32>
    %293 = arith.mulf %290, %292 : vector<16x64xf32>
    %cst_123 = arith.constant dense<0.000000e+00> : vector<16xf32>
    %294 = vector.multi_reduction <add>, %293, %cst_123 [1] : vector<16x64xf32> to vector<16xf32>
    %295 = vector.shape_cast %294 : vector<16xf32> to vector<16x1xf32>
    %cst_124 = arith.constant 6.400000e+01 : f32
    %296 = vector.broadcast %cst_124 : f32 to vector<16x1xf32>
    %297 = arith.divf %295, %296 : vector<16x1xf32>
    %298 = vector.broadcast %288 : vector<16x1xf32> to vector<16x64xf32>
    %299 = arith.subf %280, %298 : vector<16x64xf32>
    %cst_125 = arith.constant 9.99999996E-13 : f32
    %300 = vector.broadcast %cst_125 : f32 to vector<16x1xf32>
    %301 = arith.addf %297, %300 : vector<16x1xf32>
    %302 = math.rsqrt %301 : vector<16x1xf32>
    %303 = vector.broadcast %302 : vector<16x1xf32> to vector<16x64xf32>
    %304 = arith.mulf %299, %303 : vector<16x64xf32>
    %305 = vector.broadcast %282 : vector<1x64xf32> to vector<16x64xf32>
    %306 = arith.mulf %304, %305 : vector<16x64xf32>
    %307 = vector.broadcast %284 : vector<1x64xf32> to vector<16x64xf32>
    %308 = arith.addf %306, %307 : vector<16x64xf32>
    %c1_126 = arith.constant 1 : index
    %c0_127 = arith.constant 0 : index
    %c0_128 = arith.constant 0 : index
    %309 = vector.load %arg12[%c1_126, %c0_127, %c0_128] : memref<2x64x128xf32, #tpu.memory_space<vmem>>, vector<1x64x128xf32>
    %310 = vector.shape_cast %309 : vector<1x64x128xf32> to vector<64x128xf32>
    %cst_129 = arith.constant dense<0.000000e+00> : vector<16x128xf32>
    %311 = tpu.matmul %308, %310, %cst_129 {dimension_numbers = #tpu.dot_dimension_numbers<[1], [0], [0], [1], [0, 0, 1, 1], [], []>} : vector<16x64xf32>, vector<64x128xf32>, vector<16x128xf32> -> vector<16x128xf32>
    %c1_130 = arith.constant 1 : index
    %c0_131 = arith.constant 0 : index
    %c0_132 = arith.constant 0 : index
    %312 = vector.load %arg13[%c1_130, %c0_131, %c0_132] : memref<2x1x128xf32, #tpu.memory_space<vmem>>, vector<1x1x128xf32>
    %313 = vector.shape_cast %312 : vector<1x1x128xf32> to vector<1x128xf32>
    %314 = vector.broadcast %313 : vector<1x128xf32> to vector<16x128xf32>
    %315 = arith.addf %311, %314 : vector<16x128xf32>
    %316 = arith.mulf %315, %315 : vector<16x128xf32>
    %317 = arith.mulf %315, %316 : vector<16x128xf32>
    %cst_133 = arith.constant 4.471500e-02 : f32
    %318 = vector.broadcast %cst_133 : f32 to vector<16x128xf32>
    %319 = arith.mulf %318, %317 : vector<16x128xf32>
    %320 = arith.addf %315, %319 : vector<16x128xf32>
    %cst_134 = arith.constant 0.797884583 : f32
    %321 = vector.broadcast %cst_134 : f32 to vector<16x128xf32>
    %322 = arith.mulf %321, %320 : vector<16x128xf32>
    %323 = math.tanh %322 : vector<16x128xf32>
    %cst_135 = arith.constant 1.000000e+00 : f32
    %324 = vector.broadcast %cst_135 : f32 to vector<16x128xf32>
    %325 = arith.addf %324, %323 : vector<16x128xf32>
    %cst_136 = arith.constant 5.000000e-01 : f32
    %326 = vector.broadcast %cst_136 : f32 to vector<16x128xf32>
    %327 = arith.mulf %326, %325 : vector<16x128xf32>
    %328 = arith.mulf %315, %327 : vector<16x128xf32>
    %c1_137 = arith.constant 1 : index
    %c0_138 = arith.constant 0 : index
    %c0_139 = arith.constant 0 : index
    %329 = vector.load %arg14[%c1_137, %c0_138, %c0_139] : memref<2x128x64xf32, #tpu.memory_space<vmem>>, vector<1x128x64xf32>
    %330 = vector.shape_cast %329 : vector<1x128x64xf32> to vector<128x64xf32>
    %cst_140 = arith.constant dense<0.000000e+00> : vector<16x64xf32>
    %331 = tpu.matmul %328, %330, %cst_140 {dimension_numbers = #tpu.dot_dimension_numbers<[1], [0], [0], [1], [0, 0, 1, 1], [], []>} : vector<16x128xf32>, vector<128x64xf32>, vector<16x64xf32> -> vector<16x64xf32>
    %c1_141 = arith.constant 1 : index
    %c0_142 = arith.constant 0 : index
    %c0_143 = arith.constant 0 : index
    %332 = vector.load %arg15[%c1_141, %c0_142, %c0_143] : memref<2x1x64xf32, #tpu.memory_space<vmem>>, vector<1x1x64xf32>
    %333 = vector.shape_cast %332 : vector<1x1x64xf32> to vector<1x64xf32>
    %334 = vector.broadcast %333 : vector<1x64xf32> to vector<16x64xf32>
    %335 = arith.addf %331, %334 : vector<16x64xf32>
    %336 = arith.addf %308, %335 : vector<16x64xf32>
    %c1_144 = arith.constant 1 : index
    %c0_145 = arith.constant 0 : index
    %c0_146 = arith.constant 0 : index
    %337 = vector.load %arg16[%c1_144, %c0_145, %c0_146] : memref<2x1x64xf32, #tpu.memory_space<vmem>>, vector<1x1x64xf32>
    %338 = vector.shape_cast %337 : vector<1x1x64xf32> to vector<1x64xf32>
    %c1_147 = arith.constant 1 : index
    %c0_148 = arith.constant 0 : index
    %c0_149 = arith.constant 0 : index
    %339 = vector.load %arg17[%c1_147, %c0_148, %c0_149] : memref<2x1x64xf32, #tpu.memory_space<vmem>>, vector<1x1x64xf32>
    %340 = vector.shape_cast %339 : vector<1x1x64xf32> to vector<1x64xf32>
    %cst_150 = arith.constant dense<0.000000e+00> : vector<16xf32>
    %341 = vector.multi_reduction <add>, %336, %cst_150 [1] : vector<16x64xf32> to vector<16xf32>
    %342 = vector.shape_cast %341 : vector<16xf32> to vector<16x1xf32>
    %cst_151 = arith.constant 6.400000e+01 : f32
    %343 = vector.broadcast %cst_151 : f32 to vector<16x1xf32>
    %344 = arith.divf %342, %343 : vector<16x1xf32>
    %345 = vector.broadcast %344 : vector<16x1xf32> to vector<16x64xf32>
    %346 = arith.subf %336, %345 : vector<16x64xf32>
    %347 = vector.broadcast %344 : vector<16x1xf32> to vector<16x64xf32>
    %348 = arith.subf %336, %347 : vector<16x64xf32>
    %349 = arith.mulf %346, %348 : vector<16x64xf32>
    %cst_152 = arith.constant dense<0.000000e+00> : vector<16xf32>
    %350 = vector.multi_reduction <add>, %349, %cst_152 [1] : vector<16x64xf32> to vector<16xf32>
    %351 = vector.shape_cast %350 : vector<16xf32> to vector<16x1xf32>
    %cst_153 = arith.constant 6.400000e+01 : f32
    %352 = vector.broadcast %cst_153 : f32 to vector<16x1xf32>
    %353 = arith.divf %351, %352 : vector<16x1xf32>
    %354 = vector.broadcast %344 : vector<16x1xf32> to vector<16x64xf32>
    %355 = arith.subf %336, %354 : vector<16x64xf32>
    %cst_154 = arith.constant 9.99999996E-13 : f32
    %356 = vector.broadcast %cst_154 : f32 to vector<16x1xf32>
    %357 = arith.addf %353, %356 : vector<16x1xf32>
    %358 = math.rsqrt %357 : vector<16x1xf32>
    %359 = vector.broadcast %358 : vector<16x1xf32> to vector<16x64xf32>
    %360 = arith.mulf %355, %359 : vector<16x64xf32>
    %361 = vector.broadcast %338 : vector<1x64xf32> to vector<16x64xf32>
    %362 = arith.mulf %360, %361 : vector<16x64xf32>
    %363 = vector.broadcast %340 : vector<1x64xf32> to vector<16x64xf32>
    %364 = arith.addf %362, %363 : vector<16x64xf32>
    %365 = tpu.iota {dimensions = array<i32: 1>} : vector<2x16xi32>
    %366 = tpu.iota {dimensions = array<i32: 0>} : vector<2x16xi32>
    %c8_i32 = arith.constant 8 : i32
    %367 = vector.broadcast %c8_i32 : i32 to vector<2x16xi32>
    %368 = arith.muli %366, %367 : vector<2x16xi32>
    %369 = arith.cmpi eq, %365, %368 : vector<2x16xi32>
    %370 = arith.extui %369 : vector<2x16xi1> to vector<2x16xi32>
    %371 = arith.sitofp %370 : vector<2x16xi32> to vector<2x16xf32>
    %cst_155 = arith.constant dense<0.000000e+00> : vector<2x64xf32>
    %372 = tpu.matmul %371, %364, %cst_155 {dimension_numbers = #tpu.dot_dimension_numbers<[1], [0], [0], [1], [0, 0, 1, 1], [], []>} : vector<2x16xf32>, vector<16x64xf32>, vector<2x64xf32> -> vector<2x64xf32>
    %c0_156 = arith.constant 0 : index
    %c0_157 = arith.constant 0 : index
    %373 = vector.load %arg18[%c0_156, %c0_157] : memref<64x128xf32, #tpu.memory_space<vmem>>, vector<64x128xf32>
    %cst_158 = arith.constant dense<0.000000e+00> : vector<2x128xf32>
    %374 = tpu.matmul %372, %373, %cst_158 {dimension_numbers = #tpu.dot_dimension_numbers<[1], [0], [0], [1], [0, 0, 1, 1], [], []>} : vector<2x64xf32>, vector<64x128xf32>, vector<2x128xf32> -> vector<2x128xf32>
    %c0_159 = arith.constant 0 : index
    %c0_160 = arith.constant 0 : index
    %375 = vector.load %arg19[%c0_159, %c0_160] : memref<1x128xf32, #tpu.memory_space<vmem>>, vector<1x128xf32>
    %376 = vector.broadcast %375 : vector<1x128xf32> to vector<2x128xf32>
    %377 = arith.addf %374, %376 : vector<2x128xf32>
    %c0_161 = arith.constant 0 : index
    %c0_162 = arith.constant 0 : index
    %378 = vector.load %arg20[%c0_161, %c0_162] : memref<2x128xf32, #tpu.memory_space<vmem>>, vector<2x128xf32>
    tpu.vector_store %arg20[%c0_161, %c0_162], %377 {strides = array<i32>} : memref<2x128xf32, #tpu.memory_space<vmem>>, vector<2x128xf32>,
    return
  }
}

</mosaic_0001>

<bundles_post_ra>
// kernel: eq.9
= control target key start
LH: loop header
LB: loop body
LE: loop exit
PB: predicated region body
PF: predicated region fallthrough
CT: control target
= control target key end

     0   :  { %vm8_vm0 = vcmask 64512   ;;  %vm14_vm1 = vcmask 130112   ;;  %s42_s0 = inlined_call_operand.vmem [shape: s32[2,8], index: 0, kind: input, shape index: {}]   ;;  %s43_s1 = inlined_call_operand.vmem [shape: s32[16], index: 1, kind: output, shape index: {}]  }
   0x1   :  { %v5_v0 = vld [vmem:[%s42_s0] sm:$0x3]  ;;  %s25_s0 = smov 8  }
   0x2   :  { %6 = vst [vmem:[#allocation1] sm:$0x3] %v5_v0 }
   0x9   :  { %v11_v1 = vld [vmem:[#allocation1 + $0x1] sm:$0x1]   ;;  %v7_v2 = vld [vmem:[#allocation1] sm:$0x1]  }
   0xa   :  { %12 = vrot.lane.b32.xlu0 %v11_v1, %s25_s0  ;;  %9 = vst.msk [vmem:[#allocation0] sm:$0x1] %vm8_vm0, %v7_v2  }
  0x7c   :  { %v13_v3 = vpop.permute.xlu0 %12  }
  0x7d   :  { %15 = vst.msk [vmem:[#allocation0] sm:$0x1] %vm14_vm1, %v13_v3  }
  0x84   :  { %v20_v4 = vld [vmem:[#allocation0] sm:$0x1] }
  0x85   :  { %23 = vst [vmem:[%s43_s1] sm:$0x1] %v20_v4 }

// kernel: ccf_forward.1
= control target key start
LH: loop header
LB: loop body
LE: loop exit
PB: predicated region body
PF: predicated region fallthrough
CT: control target
= control target key end

     0   :  { %s4806_s0 = inlined_call_operand.vmem [shape: s32[16,1], index: 0, kind: input, shape index: {}]   ;;  %s4807_s1 = inlined_call_operand.vmem [shape: f32[16,16], index: 1, kind: input, shape index: {}]   ;;  %s4808_s2 = inlined_call_operand.vmem [shape: f32[16,64], index: 2, kind: input, shape index: {}]   ;;  %s4809_s3 = inlined_call_operand.vmem [shape: f32[128,64], index: 3, kind: input, shape index: {}]   ;;  %s4810_s4 = inlined_call_operand.vmem [shape: f32[1,64], index: 4, kind: input, shape index: {}]   ;;  %s4811_s5 = inlined_call_operand.vmem [shape: f32[1,64], index: 5, kind: input, shape index: {}]   ;;  %s4812_s6 = inlined_call_operand.vmem [shape: f32[2,64,192], index: 6, kind: input, shape index: {}]   ;;  %s4813_s7 = inlined_call_operand.vmem [shape: f32[2,1,192], index: 7, kind: input, shape index: {}]   ;;  %s4814_s8 = inlined_call_operand.vmem [shape: f32[2,64,64], index: 8, kind: input, shape index: {}]   ;;  %s4815_s9 = inlined_call_operand.vmem [shape: f32[2,1,64], index: 9, kind: input, shape index: {}]   ;;  %s4816_s10 = inlined_call_operand.vmem [shape: f32[2,1,64], index: 10, kind: input, shape index: {}]   ;;  %s4817_s11 = inlined_call_operand.vmem [shape: f32[2,1,64], index: 11, kind: input, shape index: {}]   ;;  %s4818_s12 = inlined_call_operand.vmem [shape: f32[2,64,128], index: 12, kind: input, shape index: {}]   ;;  %s4819_s13 = inlined_call_operand.vmem [shape: f32[2,1,128], index: 13, kind: input, shape index: {}]   ;;  %s4820_s14 = inlined_call_operand.vmem [shape: f32[2,128,64], index: 14, kind: input, shape index: {}]   ;;  %s4821_s15 = inlined_call_operand.vmem [shape: f32[2,1,64], index: 15, kind: input, shape index: {}]   ;;  %s4822_s16 = inlined_call_operand.vmem [shape: f32[2,1,64], index: 16, kind: input, shape index: {}]   ;;  %s4823_s17 = inlined_call_operand.vmem [shape: f32[2,1,64], index: 17, kind: input, shape index: {}]   ;;  %s4824_s18 = inlined_call_operand.hbm [shape: f32[64,128], index: 18, kind: input, shape index: {}]   ;;  %s4825_s19 = inlined_call_operand.vmem [shape: f32[1,128], index: 19, kind: input, shape index: {}]   ;;  %s4826_s20 = inlined_call_operand.hbm [shape: f32[2,128], index: 20, kind: output, shape index: {}]  }
   0x1   :  { %4833 = sst [smem:[#allocation8_spill]] %s4806_s0 }
   0x2   :  { %4834 = sst [smem:[#allocation9_spill]] %s4807_s1 }
   0x3   :  { %4835 = sst [smem:[#allocation10_spill]] %s4808_s2 }
   0x4   :  { %4836 = sst [smem:[#allocation11_spill]] %s4809_s3 }
   0x5   :  { %4837 = sst [smem:[#allocation12_spill]] %s4810_s4 }
   0x6   :  { %25 = vsyncpa [#allocation3], 0 }
   0x7   :  { %26 = vsyncpa [#allocation4], 0  ;;  %s3888_s1 = smov [#allocation2]  }
   0x8   :  { %s68_s22 = sshll.u32 %s3888_s1, 4  ;;  %s69_s22 = int_to_ptr.vmem [resolvable:$true] %s68_s22 }
   0x9   :  { %s3852_s23 = scalar_lea.vmem %s69_s22, 1024  ;;  %p3857_p1 = scmp.lt.s32.totalorder %s69_s22, %s69_s22 }
   0xa   :  { %p3853_p0 = scmp.ne.s32.totalorder %s69_s22, %s3852_s23  ;;  %p3858_p2 = scmp.lt.s32.totalorder %s3852_s23, %s3852_s23 }
   0xc   :  { %p3859_p3 = por %p3858_p2, %p3857_p1 }
   0xe   :  { %p3860_p4 = pnand %p3859_p3, %p3853_p0 }
  0x10   :  { %3863 = shalt.err (!%p3860_p4)
}
  0x11   :  { %s3889_s24 = smov 128   ;;  %s3890_s2 = smov 8  }
  0x12   :  { %74 = dma.hbm_to_vmem [thread:$0]  %s4824_s18, 1024, %s69_s22, [#allocation3], %s3889_s24, %s3889_s24, %s3890_s2  }
  0x13   :  { %3884 = dma.done.wait [#allocation3], 1024  }
  0x14   :  { %3885 = vsyncadd [#allocation3], 4294966272  ;;  %v3891_v0 = vmov 0   ;;  %s4838_s28 = sld [smem:[#allocation8_spill]]  ;;  %v80_v19 = vlaneseq  ;;  %v3892_v22 = vmov 1.0   ;;  %vm191_vm2 = vcmask 523264  }
  0x15   :  { %3749 = vset.pattern.permute.xlu0 %v3891_v0  ;;  %s4839_s30 = sld [smem:[#allocation11_spill]]  ;;  %v252_v42 = vld [vmem:[%s4812_s6 + $0x78] sm:$0xff]  ;;  %v251_v43 = vld [vmem:[%s4812_s6 + $0x70] sm:$0xff]  ;;  %v250_v44 = vld [vmem:[%s4812_s6 + $0x68] sm:$0xff]  ;;  %v3893_v47 = vmov 0.0   ;;  %vm354_vm3 = vcmask 130048  }
  0x16   :  { %v4066_v20 = vand.u32 127, %v80_v19  ;;  %s4840_s18 = sld [smem:[#allocation10_spill]]  ;;  %287 = vmatprep.subr.mxu1 %v252_v42  ;;  %v249_v45 = vld [vmem:[%s4812_s6 + $0x60] sm:$0xff]  ;;  %v248_v46 = vld [vmem:[%s4812_s6 + $0x58] sm:$0xff]  ;;  %335 = vmatprep.mubr.f32.mxu1 %v3893_v47  ;;  %v247_v48 = vld [vmem:[%s4812_s6 + $0x50] sm:$0xff]  ;;  %s3897_s22 = smov 32  }
  0x17   :  { %288 = vmatpush1.msra.mxu1 %v251_v43  ;;  %v246_v49 = vld [vmem:[%s4812_s6 + $0x48] sm:$0xff]  ;;  %v245_v50 = vld [vmem:[%s4812_s6 + $0x40] sm:$0xff]  ;;  %v244_v51 = vld [vmem:[%s4812_s6 + $0x38] sm:$0xff]  ;;  %s4841_s25 = sld [smem:[#allocation12_spill]]  ;;  %s3898_s23 = smov 112   ;;  %vm1169_vm4 = vcmask 261120  }
  0x18   :  { %289 = vmatprep.subr.mxu1 %v250_v44  ;;  %v243_v52 = vld [vmem:[%s4812_s6 + $0x30] sm:$0xff]  ;;  %v242_v53 = vld [vmem:[%s4812_s6 + $0x28] sm:$0xff]  ;;  %v241_v54 = vld [vmem:[%s4812_s6 + $0x20] sm:$0xff]  ;;  %s4842_s0 = sld [smem:[#allocation9_spill]]  ;;  %s3899_s24 = smov 16   ;;  %vm1172_vm5 = vcmask 392192  }
  0x19   :  { %290 = vmatpush1.msra.mxu1 %v249_v45  ;;  %v240_v55 = vld [vmem:[%s4812_s6 + $0x18] sm:$0xff]  ;;  %v239_v56 = vld [vmem:[%s4812_s6 + $0x10] sm:$0xff]  ;;  %v238_v57 = vld [vmem:[%s4812_s6 + $0x8] sm:$0xff]  ;;  %s4831_s2 = smov 80   ;;  %vm3901_vm6 = vmmov 0  }
  0x1a   :  { %v82_v1 = vld [vmem:[%s4838_s28] sm:$0xff]  ;;  %v83_v4 = vld [vmem:[%s4838_s28 + $0x8] sm:$0xff]  ;;  %291 = vmatprep.subr.mxu1 %v248_v46  ;;  %s3894_s28 = smov 64  }
  0x1b   :  { %v111_v2 = vld [vmem:[%s4839_s30 + $0x78] sm:$0xff]  ;;  %85 = vperm.xlu0 %3749, %v82_v1   ;;  %v110_v3 = vld [vmem:[%s4839_s30 + $0x70] sm:$0xff]  ;;  %v109_v5 = vld [vmem:[%s4839_s30 + $0x68] sm:$0xff]  ;;  %292 = vmatpush1.msra.mxu1 %v247_v48 }
  0x1c   :  { %3415 = vmatprep.subr.mxu0 %v111_v2  ;;  %v108_v6 = vld [vmem:[%s4839_s30 + $0x60] sm:$0xff]  ;;  %v107_v7 = vld [vmem:[%s4839_s30 + $0x58] sm:$0xff]  ;;  %v106_v8 = vld [vmem:[%s4839_s30 + $0x50] sm:$0xff]  ;;  %293 = vmatprep.subr.mxu1 %v246_v49 }
  0x1d   :  { %3416 = vmatpush3.msra.mxu0 %v111_v2  ;;  %v105_v9 = vld [vmem:[%s4839_s30 + $0x48] sm:$0xff]  ;;  %v104_v10 = vld [vmem:[%s4839_s30 + $0x40] sm:$0xff]  ;;  %v103_v11 = vld [vmem:[%s4839_s30 + $0x38] sm:$0xff]  ;;  %294 = vmatpush1.msra.mxu1 %v245_v50 }
  0x1e   :  { %3417 = vmatprep.subr.mxu0 %v110_v3  ;;  %v102_v12 = vld [vmem:[%s4839_s30 + $0x30] sm:$0xff]  ;;  %v101_v13 = vld [vmem:[%s4839_s30 + $0x28] sm:$0xff]  ;;  %v100_v14 = vld [vmem:[%s4839_s30 + $0x20] sm:$0xff]  ;;  %295 = vmatprep.subr.mxu1 %v244_v51 }
  0x1f   :  { %3418 = vmatpush3.msra.mxu0 %v110_v3  ;;  %88 = vperm.xlu0 %3749, %v83_v4   ;;  %v99_v15 = vld [vmem:[%s4839_s30 + $0x18] sm:$0xff]  ;;  %v98_v16 = vld [vmem:[%s4839_s30 + $0x10] sm:$0xff]  ;;  %v97_v17 = vld [vmem:[%s4839_s30 + $0x8] sm:$0xff] }
  0x20   :  { %3419 = vmatprep.subr.mxu0 %v109_v5  ;;  %v96_v18 = vld [vmem:[%s4839_s30] sm:$0xff]  ;;  %v113_v26 = vld [vmem:[%s4840_s18 + $0x8] sm:$0xff]  ;;  %296 = vmatpush1.msra.mxu1 %v243_v52  ;;  %s3895_s30 = smov 48  }
  0x21   :  { %3420 = vmatpush3.msra.mxu0 %v109_v5  ;;  %v112_v25 = vld [vmem:[%s4840_s18] sm:$0xff]  ;;  %297 = vmatprep.subr.mxu1 %v242_v53  ;;  %s3896_s18 = smov 96  }
  0x22   :  { %3421 = vmatprep.subr.mxu0 %v108_v6  ;;  %298 = vmatpush1.msra.mxu1 %v241_v54  ;;  %v237_v58 = vld [vmem:[%s4812_s6] sm:$0xff] }
  0x23   :  { %3422 = vmatpush3.msra.mxu0 %v108_v6  ;;  %299 = vmatprep.subr.mxu1 %v240_v55  ;;  %v3109_v2 = vld [vmem:[%s4841_s25] ss:$0 sm:$0xff] }
  0x24   :  { %3423 = vmatprep.subr.mxu0 %v107_v7  ;;  %300 = vmatpush1.msra.mxu1 %v239_v56  ;;  %v3110_v4 = vld [vmem:[%s4811_s5] ss:$0 sm:$0xff]  ;;  %s3902_s5 = smov [#allocation5]  }
  0x25   :  { %3424 = vmatpush3.msra.mxu0 %v107_v7  ;;  %301 = vmatprep.subr.mxu1 %v238_v57  ;;  %s3096_s27 = sshll.u32 %s3902_s5, 4  ;;  %s3097_s27 = int_to_ptr.vmem [resolvable:$true] %s3096_s27 }
  0x26   :  { %3425 = vmatprep.subr.mxu0 %v106_v8  ;;  %302 = vmatpush1.msra.mxu1 %v237_v58  ;;  %s3864_s4 = scalar_lea.vmem %s3097_s27, 32  ;;  %p3869_p6 = scmp.lt.s32.totalorder %s3097_s27, %s3097_s27 }
  0x27   :  { %3426 = vmatpush3.msra.mxu0 %v106_v8  ;;  %p3865_p5 = scmp.ne.s32.totalorder %s3097_s27, %s3864_s4  ;;  %p3870_p7 = scmp.lt.s32.totalorder %s3864_s4, %s3864_s4 }
  0x28   :  { %3427 = vmatprep.subr.mxu0 %v105_v9 }
  0x29   :  { %3428 = vmatpush3.msra.mxu0 %v105_v9  ;;  %p3871_p8 = por %p3870_p7, %p3869_p6 }
  0x2a   :  { %3429 = vmatprep.subr.mxu0 %v104_v10 }
  0x2b   :  { %3430 = vmatpush3.msra.mxu0 %v104_v10  ;;  %p3872_p9 = pnand %p3871_p8, %p3865_p5 }
  0x2c   :  { %3431 = vmatprep.subr.mxu0 %v103_v11 }
  0x2d   :  { %3432 = vmatpush3.msra.mxu0 %v103_v11  ;;  %v4145_v11 = vshrl.u32 %v80_v19, 7 }
  0x2e   :  { %3433 = vmatprep.subr.mxu0 %v102_v12 }
  0x2f   :  { %3434 = vmatpush3.msra.mxu0 %v102_v12  ;;  %v257_v12 = vsub.s32 0, %v4145_v11 }
  0x30   :  { %3435 = vmatprep.subr.mxu0 %v101_v13 }
  0x31   :  { %3436 = vmatpush3.msra.mxu0 %v101_v13  ;;  %v253_v13 = vld [vmem:[%s4813_s7] sm:$0x3] }
  0x32   :  { %3437 = vmatprep.subr.mxu0 %v100_v14 }
  0x33   :  { %3438 = vmatpush3.msra.mxu0 %v100_v14  ;;  %v258_v14 = vrot.slane %v253_v13, %v257_v12 }
  0x34   :  { %3439 = vmatprep.subr.mxu0 %v99_v15 }
  0x35   :  { %3440 = vmatpush3.msra.mxu0 %v99_v15 }
  0x36   :  { %3441 = vmatprep.subr.mxu0 %v98_v16 }
  0x37   :  { %3442 = vmatpush3.msra.mxu0 %v98_v16 }
  0x38   :  { %3443 = vmatprep.subr.mxu0 %v97_v17 }
  0x39   :  { %3444 = vmatpush3.msra.mxu0 %v97_v17 }
  0x3a   :  { %3445 = vmatprep.subr.mxu0 %v96_v18 }
  0x3b   :  { %3446 = vmatpush3.msra.mxu0 %v96_v18 }
  0x96   :  { %v86_v21 = vpop.permute.xlu0 %85 }
  0x97   :  { %vm90_vm0 = vcmp.eq.s32.totalorder %v4066_v20, %v86_v21  ;;  %v261_v21 = vsub.s32 1, %v4145_v11 }
  0x98   :  { %3447 = vmatprep.mubr.msk.f32.mxu0 %vm90_vm0, %v3892_v22 }
  0x9a   :  { %v89_v23 = vpop.permute.xlu0 %88 }
  0x9b   :  { %vm91_vm1 = vcmp.eq.s32.totalorder %v4066_v20, %v89_v23 }
  0x9c   :  { %3448 = vmatmul.mubr.msk.f32.vlgmr.msra.gmra.mxu0 %vm91_vm1, %v3892_v22 }
 0x15c   :  { %v3449_v24 = vpop.f32.mrf.mxu0 }
 0x15d   :  { %v186_v29 = vadd.f32 %v3449_v24, %v113_v26  ;;  %v262_v24 = vrot.slane %v253_v13, %v261_v21 }
 0x15e   :  { %v180_v27 = vpop.f32.mrf.mxu0 }
 0x15f   :  { %v181_v28 = vadd.f32 %v180_v27, %v112_v25  ;;  %v195_v31 = vsel %vm191_vm2, %v186_v29, 0.0 }
 0x161   :  { %v192_v30 = vsel %vm191_vm2, %v181_v28, 0.0 }
 0x162   :  { %193 = vadd.xlane.f32.xlu1 %v192_v30  ;;  %v4188_v30 = vld [vmem:[%s4842_s0] sm:$0xff] }
 0x166   :  { %196 = vadd.xlane.f32.xlu1 %v195_v31 }
 0x1eb   :  { %v194_v32 = vpop.xlane.xlu1 %193 }
 0x1ec   :  { %v199_v33 = vmul.f32 0.015625, %v194_v32 }
 0x1ee   :  { %v201_v34 = vsub.f32 %v181_v28, %v199_v33  ;;  %v4183_v28 = vld [vmem:[%s4842_s0 + $0x8] sm:$0xff] }
 0x1ef   :  { %v197_v35 = vpop.xlane.xlu1 %196 }
 0x1f0   :  { %v200_v36 = vmul.f32 0.015625, %v197_v35  ;;  %v203_v37 = vmul.f32 %v201_v34, %v201_v34 }
 0x1f2   :  { %v202_v38 = vsub.f32 %v186_v29, %v200_v36  ;;  %v205_v39 = vsel %vm191_vm2, %v203_v37, 0.0 }
 0x1f3   :  { %206 = vadd.xlane.f32.xlu0 %v205_v39 }
 0x1f4   :  { %v204_v40 = vmul.f32 %v202_v38, %v202_v38 }
 0x1f6   :  { %v208_v41 = vsel %vm191_vm2, %v204_v40, 0.0 }
 0x1f7   :  { %209 = vadd.xlane.f32.xlu1 %v208_v41 }
 0x27c   :  { %v207_v59 = vpop.xlane.xlu0 %206 }
 0x27d   :  { %v211_v60 = vmul.f32 0.015625, %v207_v59 }
 0x27f   :  { %v213_v61 = vadd.f32 1e-12, %v211_v60 }
 0x280   :  { %v210_v62 = vpop.xlane.xlu1 %209 }
 0x281   :  { %3750 = vrsqrt.f32 %v213_v61  ;;  %v212_v63 = vmul.f32 0.015625, %v210_v62 }
 0x283   :  { %v214_v0 = vadd.f32 1e-12, %v212_v63 }
 0x285   :  { %3752 = vrsqrt.f32 %v214_v0 }
 0x28e   :  { %v3751_v1 = vpop.eup %3750 }
 0x28f   :  { %v217_v3 = vmul.f32 %v3751_v1, %v201_v34 }
 0x291   :  { %v225_v5 = vmul.f32 %v3109_v2, %v217_v3 }
 0x292   :  { %v3753_v6 = vpop.eup %3752 }
 0x293   :  { %v4135_v7 = vadd.f32 %v3110_v4, %v225_v5  ;;  %v218_v8 = vmul.f32 %v3753_v6, %v202_v38 }
 0x295   :  { %3111 = vmatmul.mubr.msk.f32.vlgmr.msra.gmra.mxu1 %vm191_vm2, %v4135_v7  ;;  %v226_v9 = vmul.f32 %v3109_v2, %v218_v8 }
 0x296   :  { %341 = vmatprep.mubr.f32.mxu1 %v3893_v47 }
 0x297   :  { %v4140_v10 = vadd.f32 %v3110_v4, %v226_v9 }
 0x299   :  { %3112 = vmatmul.mubr.msk.f32.gmra.mxu1 %vm191_vm2, %v4140_v10 }
 0x355   :  { %v337_v15 = vpop.f32.mrf.mxu1 }
 0x356   :  { %v4153_v16 = vadd.f32 %v337_v15, %v258_v14 }
 0x357   :  { %v339_v17 = vpop.f32.mrf.mxu1 }
 0x358   :  { %3454 = vmatprep.mubr.msk.f32.mxu1 %vm354_vm3, %v4153_v16  ;;  %v4173_v27 = vadd.f32 %v339_v17, %v262_v24 }
 0x359   :  { %v343_v18 = vpop.f32.mrf.mxu1 }
 0x35a   :  { %v4157_v19 = vadd.f32 %v343_v18, %v258_v14 }
 0x35b   :  { %v345_v23 = vpop.f32.mrf.mxu1 }
 0x35c   :  { %352 = vrot.lane.b32.xlu1 %v4157_v19, %s3894_s28  ;;  %v4168_v26 = vadd.f32 %v345_v23, %v262_v24 }
 0x360   :  { %350 = vrot.lane.b32.xlu1 %v4153_v16, %s3894_s28 }
 0x3ce   :  { %v353_v22 = vpop.permute.xlu1 %352 }
 0x3cf   :  { %3450 = vmatprep.subr.msk.mxu1 %vm354_vm3, %v353_v22 }
 0x3d0   :  { %3451 = vmatpush3.xpose.msk.msra.mxu1 %vm354_vm3, %v353_v22 }
 0x3d2   :  { %v351_v25 = vpop.permute.xlu1 %350 }
 0x3d3   :  { %3452 = vmatprep.subr.msk.mxu1 %vm354_vm3, %v351_v25 }
 0x3d4   :  { %3453 = vmatpush3.xpose.msk.msra.mxu1 %vm354_vm3, %v351_v25 }
 0x3d5   :  { %3457 = vmatprep.subr.mxu1 %v4168_v26 }
 0x3d7   :  { %3455 = vmatmul.mubr.msk.f32.vlgmr.msra.gmra.mxu1 %vm354_vm3, %v4157_v19 }
 0x3d8   :  { %3458 = vmatpush3.msra.mxu1 %v4168_v26 }
 0x3d9   :  { %3459 = vmatprep.subr.mxu1 %v4173_v27 }
 0x3da   :  { %3460 = vmatpush3.msra.mxu1 %v4173_v27 }
 0x497   :  { %v3456_v29 = vpop.f32.mrf.mxu1 }
 0x498   :  { %v435_v31 = vadd.f32 %v3456_v29, %v4183_v28 }
 0x499   :  { %v429_v32 = vpop.f32.mrf.mxu1 }
 0x49a   :  { %v430_v33 = vadd.f32 %v429_v32, %v4188_v30  ;;  %v441_v34 = vsel %vm354_vm3, %v435_v31, -inf }
 0x49b   :  { %442 = vmax.xlane.f32.xlu0 %v441_v34 }
 0x49c   :  { %v438_v35 = vsel %vm354_vm3, %v430_v33, -inf }
 0x49d   :  { %439 = vmax.xlane.f32.xlu1 %v438_v35 }
 0x4ae   :  { %545 = vrot.lane.b32.xlu1 %v4153_v16, %s3895_s30 }
 0x4b1   :  { %547 = vrot.lane.b32.xlu0 %v4157_v19, %s3895_s30 }
 0x4b2   :  { %743 = vrot.lane.b32.xlu1 %v4153_v16, %s3896_s18 }
 0x4b5   :  { %749 = vrot.lane.b32.xlu0 %v4157_v19, %s3897_s22 }
 0x524   :  { %v443_v36 = vpop.xlane.xlu0 %442 }
 0x525   :  { %v445_v37 = vsub.f32 %v435_v31, %v443_v36 }
 0x526   :  { %v440_v38 = vpop.xlane.xlu1 %439 }
 0x527   :  { %v448_v39 = vmul.f32 1.442695, %v445_v37  ;;  %v444_v40 = vsub.f32 %v430_v33, %v440_v38 }
 0x528   :  { %v548_v41 = vpop.permute.xlu0 %547 }
 0x529   :  { %3754 = vpow2.f32 %v448_v39  ;;  %v446_v42 = vmul.f32 1.442695, %v444_v40  ;;  %3464 = vmatprep.subr.msk.mxu1 %vm354_vm3, %v548_v41 }
 0x52a   :  { %v546_v43 = vpop.permute.xlu1 %545 }
 0x52b   :  { %3756 = vpow2.f32 %v446_v42 }
 0x52c   :  { %v750_v44 = vpop.permute.xlu0 %749 }
 0x52d   :  { %3478 = vmatprep.subr.msk.mxu0 %vm354_vm3, %v750_v44 }
 0x52e   :  { %3479 = vmatpush3.xpose.msk.msra.mxu0 %vm354_vm3, %v750_v44  ;;  %v744_v45 = vpop.permute.xlu1 %743 }
 0x52f   :  { %3482 = vmatprep.mubr.msk.f32.mxu0 %vm354_vm3, %v744_v45 }
 0x536   :  { %v3755_v46 = vpop.eup %3754 }
 0x537   :  { %v453_v48 = vsel %vm354_vm3, %v3755_v46, 0.0 }
 0x538   :  { %v3757_v49 = vpop.eup %3756  ;;  %454 = vadd.xlane.f32.xlu0 %v453_v48 }
 0x539   :  { %v450_v50 = vsel %vm354_vm3, %v3757_v49, 0.0 }
 0x53c   :  { %451 = vadd.xlane.f32.xlu0 %v450_v50 }
 0x552   :  { %541 = vrot.lane.b32.xlu0 %v4153_v16, %s3898_s23 }
 0x556   :  { %543 = vrot.lane.b32.xlu0 %v4157_v19, %s3898_s23 }
 0x55a   :  { %747 = vrot.lane.b32.xlu0 %v4153_v16, %s3897_s22 }
 0x55e   :  { %745 = vrot.lane.b32.xlu0 %v4157_v19, %s3896_s18 }
 0x5c1   :  { %v455_v51 = vpop.xlane.xlu0 %454 }
 0x5c2   :  { %3758 = vrcp.f32 %v455_v51 }
 0x5c5   :  { %v452_v52 = vpop.xlane.xlu0 %451 }
 0x5c6   :  { %3760 = vrcp.f32 %v452_v52 }
 0x5c9   :  { %v542_v53 = vpop.permute.xlu0 %541 }
 0x5cd   :  { %v544_v54 = vpop.permute.xlu0 %543 }
 0x5cf   :  { %v3759_v56 = vpop.eup %3758 }
 0x5d0   :  { %v459_v60 = vmul.f32 %v3759_v56, %v3755_v46 }
 0x5d1   :  { %v748_v55 = vpop.permute.xlu0 %747 }
 0x5d2   :  { %3480 = vmatprep.subr.msk.mxu0 %vm354_vm3, %v748_v55 }
 0x5d3   :  { %v3761_v57 = vpop.eup %3760  ;;  %3481 = vmatpush3.xpose.msk.msra.mxu0 %vm354_vm3, %v748_v55 }
 0x5d4   :  { %v458_v58 = vmul.f32 %v3761_v57, %v3757_v49 }
 0x5d5   :  { %v746_v59 = vpop.permute.xlu0 %745 }
 0x5d6   :  { %3461 = vmatprep.mubr.msk.f32.mxu1 %vm354_vm3, %v458_v58  ;;  %3483 = vmatmul.mubr.msk.f32.vlgmr.msra.gmra.mxu0 %vm354_vm3, %v746_v59 }
 0x5d7   :  { %3462 = vmatmul.mubr.msk.f32.vlgmr.msra.gmra.mxu1 %vm354_vm3, %v459_v60 }
 0x5d8   :  { %3465 = vmatpush3.xpose.msk.msra.mxu1 %vm354_vm3, %v548_v41  ;;  %3468 = vmatprep.mubr.msk.f32.mxu1 %vm354_vm3, %v542_v53 }
 0x5d9   :  { %3466 = vmatprep.subr.msk.mxu1 %vm354_vm3, %v546_v43 }
 0x5dc   :  { %3467 = vmatpush3.xpose.msk.msra.mxu1 %vm354_vm3, %v546_v43 }
 0x5df   :  { %3469 = vmatmul.mubr.msk.f32.vlgmr.msra.gmra.mxu1 %vm354_vm3, %v544_v54 }
 0x696   :  { %v3484_v62 = vpop.f32.mrf.mxu0 }
 0x697   :  { %v4226_v61 = vpop.f32.mrf.mxu1  ;;  %v831_v8 = vadd.f32 %v3484_v62, %v4183_v28 }
 0x698   :  { %v825_v0 = vpop.f32.mrf.mxu0 }
 0x699   :  { %v4228_v63 = vpop.f32.mrf.mxu1  ;;  %v826_v4 = vadd.f32 %v825_v0, %v4188_v30  ;;  %v837_v14 = vsel %vm354_vm3, %v831_v8, -inf }
 0x69b   :  { %v834_v13 = vsel %vm354_vm3, %v826_v4, -inf }
 0x69f   :  { %v3470_v1 = vpop.f32.mrf.mxu1 }
 0x6a0   :  { %v629_v2 = vadd.f32 %v3470_v1, %v4183_v28 }
 0x6a1   :  { %v623_v3 = vpop.f32.mrf.mxu1 }
 0x6a2   :  { %v624_v5 = vadd.f32 %v623_v3, %v4188_v30  ;;  %v635_v6 = vsel %vm354_vm3, %v629_v2, -inf }
 0x6a3   :  { %636 = vmax.xlane.f32.xlu0 %v635_v6 }
 0x6a4   :  { %v632_v9 = vsel %vm354_vm3, %v624_v5, -inf }
 0x6a5   :  { %633 = vmax.xlane.f32.xlu1 %v632_v9 }
 0x6a7   :  { %835 = vmax.xlane.f32.xlu0 %v834_v13 }
 0x6a9   :  { %838 = vmax.xlane.f32.xlu1 %v837_v14 }
 0x72c   :  { %v637_v15 = vpop.xlane.xlu0 %636 }
 0x72d   :  { %v639_v37 = vsub.f32 %v629_v2, %v637_v15 }
 0x72e   :  { %v634_v17 = vpop.xlane.xlu1 %633 }
 0x72f   :  { %v638_v35 = vsub.f32 %v624_v5, %v634_v17  ;;  %v642_v38 = vmul.f32 1.442695, %v639_v37 }
 0x730   :  { %v836_v18 = vpop.xlane.xlu0 %835 }
 0x731   :  { %v840_v22 = vsub.f32 %v826_v4, %v836_v18  ;;  %v640_v36 = vmul.f32 1.442695, %v638_v35 }
 0x732   :  { %v839_v23 = vpop.xlane.xlu1 %838 }
 0x733   :  { %v842_v24 = vmul.f32 1.442695, %v840_v22  ;;  %v841_v25 = vsub.f32 %v831_v8, %v839_v23 }
 0x735   :  { %3762 = vpow2.f32 %v842_v24  ;;  %v844_v29 = vmul.f32 1.442695, %v841_v25 }
 0x737   :  { %3764 = vpow2.f32 %v844_v29 }
 0x738   :  { %3766 = vpow2.f32 %v640_v36 }
 0x739   :  { %3768 = vpow2.f32 %v642_v38  ;;  %v1182_v38 = vld [vmem:[%s4814_s8 + $0x38] sm:$0xff] }
 0x742   :  { %v3763_v31 = vpop.eup %3762 }
 0x743   :  { %v846_v32 = vsel %vm354_vm3, %v3763_v31, 0.0 }
 0x744   :  { %v3765_v33 = vpop.eup %3764  ;;  %847 = vadd.xlane.f32.xlu0 %v846_v32 }
 0x745   :  { %v849_v34 = vsel %vm354_vm3, %v3765_v33, 0.0  ;;  %v3767_v39 = vpop.eup %3766 }
 0x746   :  { %850 = vadd.xlane.f32.xlu1 %v849_v34  ;;  %v644_v40 = vsel %vm354_vm3, %v3767_v39, 0.0  ;;  %v3769_v41 = vpop.eup %3768 }
 0x747   :  { %v647_v42 = vsel %vm354_vm3, %v3769_v41, 0.0 }
 0x757   :  { %656 = vrot.lane.b32.xlu1 %v4173_v27, %s3898_s23 }
 0x75a   :  { %658 = vrot.lane.b32.xlu0 %v4168_v26, %s3898_s23 }
 0x75b   :  { %858 = vrot.lane.b32.xlu1 %v4168_v26, %s3896_s18 }
 0x779   :  { %645 = vadd.xlane.f32.xlu0 %v644_v40  ;;  %v1180_v40 = vld [vmem:[%s4814_s8 + $0x28] sm:$0xff] }
 0x77f   :  { %648 = vadd.xlane.f32.xlu1 %v647_v42  ;;  %v1178_v42 = vld [vmem:[%s4814_s8 + $0x18] sm:$0xff] }
 0x78f   :  { %856 = vrot.lane.b32.xlu0 %v4173_v27, %s3896_s18 }
 0x790   :  { %949 = vrot.lane.b32.xlu1 %v4157_v19, %s3899_s24 }
 0x793   :  { %947 = vrot.lane.b32.xlu0 %v4153_v16, %s3899_s24 }
 0x794   :  { %943 = vrot.lane.b32.xlu1 %v4153_v16, %s4831_s2 }
 0x797   :  { %945 = vrot.lane.b32.xlu0 %v4157_v19, %s4831_s2 }
 0x7cd   :  { %v848_v43 = vpop.xlane.xlu0 %847 }
 0x7cf   :  { %v851_v44 = vpop.xlane.xlu1 %850 }
 0x7d1   :  { %v659_v45 = vpop.permute.xlu0 %658 }
 0x7d2   :  { %3471 = vmatprep.subr.mxu1 %v659_v45 }
 0x7d3   :  { %3472 = vmatpush3.msra.mxu1 %v659_v45  ;;  %v657_v46 = vpop.permute.xlu1 %656  ;;  %v1175_v45 = vld [vmem:[%s4814_s8] sm:$0xff] }
 0x7d4   :  { %3473 = vmatprep.subr.mxu1 %v657_v46 }
 0x7d5   :  { %3474 = vmatpush3.msra.mxu1 %v657_v46 }
 0x7d7   :  { %v859_v48 = vpop.permute.xlu1 %858 }
 0x7d8   :  { %3485 = vmatprep.subr.mxu1 %v859_v48 }
 0x802   :  { %v646_v49 = vpop.xlane.xlu0 %645 }
 0x803   :  { %3770 = vrcp.f32 %v646_v49 }
 0x804   :  { %3772 = vrcp.f32 %v848_v43  ;;  %v1177_v43 = vld [vmem:[%s4814_s8 + $0x10] sm:$0xff] }
 0x806   :  { %v857_v56 = vpop.permute.xlu0 %856 }
 0x808   :  { %v649_v50 = vpop.xlane.xlu1 %648 }
 0x809   :  { %3774 = vrcp.f32 %v649_v50 }
 0x80a   :  { %3776 = vrcp.f32 %v851_v44  ;;  %v948_v60 = vpop.permute.xlu0 %947  ;;  %v1176_v44 = vld [vmem:[%s4814_s8 + $0x8] sm:$0xff] }
 0x80c   :  { %v950_v53 = vpop.permute.xlu1 %949 }
 0x80e   :  { %v946_v62 = vpop.permute.xlu0 %945 }
 0x810   :  { %v3771_v16 = vpop.eup %3770  ;;  %v944_v59 = vpop.permute.xlu1 %943 }
 0x811   :  { %v652_v51 = vmul.f32 %v3771_v16, %v3767_v39  ;;  %v3773_v19 = vpop.eup %3772  ;;  %v1181_v39 = vld [vmem:[%s4814_s8 + $0x30] sm:$0xff] }
 0x812   :  { %v854_v57 = vmul.f32 %v3773_v19, %v3763_v31 }
 0x813   :  { %3475 = vmatprep.mubr.msk.f32.mxu1 %vm354_vm3, %v652_v51 }
 0x816   :  { %v3775_v52 = vpop.eup %3774 }
 0x817   :  { %v653_v54 = vmul.f32 %v3775_v52, %v3769_v41  ;;  %v3777_v55 = vpop.eup %3776  ;;  %v1179_v41 = vld [vmem:[%s4814_s8 + $0x20] sm:$0xff] }
 0x818   :  { %v855_v58 = vmul.f32 %v3777_v55, %v3765_v33 }
 0x819   :  { %3476 = vmatmul.mubr.msk.f32.vlgmr.msra.gmra.mxu1 %vm354_vm3, %v653_v54 }
 0x81a   :  { %3486 = vmatpush3.msra.mxu1 %v859_v48  ;;  %3489 = vmatprep.mubr.msk.f32.mxu1 %vm354_vm3, %v854_v57 }
 0x81b   :  { %3487 = vmatprep.subr.mxu1 %v857_v56 }
 0x81c   :  { %3488 = vmatpush3.msra.mxu1 %v857_v56 }
 0x81d   :  { %3492 = vmatprep.subr.msk.mxu1 %vm354_vm3, %v950_v53  ;;  %3490 = vmatmul.mubr.msk.f32.vlgmr.msra.gmra.mxu1 %vm354_vm3, %v855_v58 }
 0x81e   :  { %3493 = vmatpush3.xpose.msk.msra.mxu1 %vm354_vm3, %v950_v53  ;;  %3496 = vmatprep.mubr.msk.f32.mxu1 %vm354_vm3, %v944_v59 }
 0x81f   :  { %3494 = vmatprep.subr.msk.mxu1 %vm354_vm3, %v948_v60 }
 0x822   :  { %3495 = vmatpush3.xpose.msk.msra.mxu1 %vm354_vm3, %v948_v60 }
 0x825   :  { %3497 = vmatmul.mubr.msk.f32.vlgmr.msra.gmra.mxu1 %vm354_vm3, %v946_v62 }
 0x8d9   :  { %v3477_v0 = vpop.f32.mrf.mxu1 }
 0x8db   :  { %v734_v1 = vpop.f32.mrf.mxu1 }
 0x8dd   :  { %v3491_v2 = vpop.f32.mrf.mxu1 }
 0x8df   :  { %v934_v3 = vpop.f32.mrf.mxu1 }
 0x8e5   :  { %v3498_v4 = vpop.f32.mrf.mxu1 }
 0x8e6   :  { %v1031_v5 = vadd.f32 %v3498_v4, %v4183_v28 }
 0x8e7   :  { %v1025_v6 = vpop.f32.mrf.mxu1 }
 0x8e8   :  { %v1026_v8 = vadd.f32 %v1025_v6, %v4188_v30  ;;  %v1037_v9 = vsel %vm354_vm3, %v1031_v5, -inf }
 0x8e9   :  { %1038 = vmax.xlane.f32.xlu0 %v1037_v9 }
 0x8ea   :  { %v1034_v13 = vsel %vm354_vm3, %v1026_v8, -inf }
 0x8eb   :  { %1035 = vmax.xlane.f32.xlu1 %v1034_v13 }
 0x972   :  { %v1039_v14 = vpop.xlane.xlu0 %1038 }
 0x973   :  { %v1041_v15 = vsub.f32 %v1031_v5, %v1039_v14 }
 0x974   :  { %v1036_v17 = vpop.xlane.xlu1 %1035 }
 0x975   :  { %v1044_v18 = vmul.f32 1.442695, %v1041_v15  ;;  %v1040_v22 = vsub.f32 %v1026_v8, %v1036_v17 }
 0x977   :  { %3778 = vpow2.f32 %v1044_v18  ;;  %v1042_v23 = vmul.f32 1.442695, %v1040_v22  ;;  %v1323_v18 = vld [vmem:[%s4818_s12 + $0x30] sm:$0xff]  ;;  %v1322_v22 = vld [vmem:[%s4818_s12 + $0x28] sm:$0xff] }
 0x979   :  { %3780 = vpow2.f32 %v1042_v23  ;;  %v1321_v23 = vld [vmem:[%s4818_s12 + $0x20] sm:$0xff] }
 0x984   :  { %v3779_v24 = vpop.eup %3778 }
 0x985   :  { %v1049_v25 = vsel %vm354_vm3, %v3779_v24, 0.0 }
 0x986   :  { %v3781_v29 = vpop.eup %3780  ;;  %1050 = vadd.xlane.f32.xlu1 %v1049_v25  ;;  %v1319_v25 = vld [vmem:[%s4818_s12 + $0x10] sm:$0xff] }
 0x987   :  { %v1046_v31 = vsel %vm354_vm3, %v3781_v29, 0.0 }
 0x988   :  { %1047 = vadd.xlane.f32.xlu0 %v1046_v31  ;;  %v1317_v31 = vld [vmem:[%s4818_s12] sm:$0xff] }
 0x997   :  { %1056 = vrot.lane.b32.xlu1 %v4173_v27, %s4831_s2 }
 0x99b   :  { %1145 = vrot.lane.b32.xlu1 %v734_v1, %s3899_s24 }
 0x99e   :  { %1058 = vrot.lane.b32.xlu0 %v4168_v26, %s4831_s2 }
 0x99f   :  { %1153 = vrot.lane.b32.xlu1 %v934_v3, %s3897_s22 }
 0x9a2   :  { %1147 = vrot.lane.b32.xlu0 %v3477_v0, %s3899_s24 }
 0x9a6   :  { %1155 = vrot.lane.b32.xlu0 %v3491_v2, %s3897_s22 }
 0xa0f   :  { %v1051_v32 = vpop.xlane.xlu1 %1050 }
 0xa10   :  { %3782 = vrcp.f32 %v1051_v32 }
 0xa11   :  { %v1048_v33 = vpop.xlane.xlu0 %1047 }
 0xa12   :  { %3784 = vrcp.f32 %v1048_v33 }
 0xa13   :  { %v1057_v35 = vpop.permute.xlu1 %1056 }
 0xa15   :  { %v1059_v34 = vpop.permute.xlu0 %1058 }
 0xa16   :  { %3499 = vmatprep.subr.mxu0 %v1059_v34 }
 0xa17   :  { %3500 = vmatpush3.msra.mxu0 %v1059_v34  ;;  %v1146_v50 = vpop.permute.xlu1 %1145 }
 0xa18   :  { %3501 = vmatprep.subr.mxu0 %v1057_v35  ;;  %v1167_v19 = vsel %vm354_vm3, %v4228_v63, %v1146_v50  ;;  %v3137_v63 = vld [vmem:[%s4815_s9] ss:$0 sm:$0xff] }
 0xa19   :  { %3502 = vmatpush3.msra.mxu0 %v1057_v35  ;;  %v1148_v49 = vpop.permute.xlu0 %1147  ;;  %v1443_v50 = vld [vmem:[%s4820_s14 + $0x60] sm:$0xff] }
 0xa1a   :  { %3506 = vmatprep.subr.mxu0 %v1182_v38  ;;  %v1168_v53 = vsel %vm354_vm3, %v4226_v61, %v1148_v49  ;;  %v1444_v49 = vld [vmem:[%s4820_s14 + $0x68] sm:$0xff] }
 0xa1b   :  { %v1154_v51 = vpop.permute.xlu1 %1153 }
 0xa1c   :  { %v1170_v54 = vsel %vm1169_vm4, %v1167_v19, %v1154_v51  ;;  %v1441_v51 = vld [vmem:[%s4820_s14 + $0x50] sm:$0xff]  ;;  %v1440_v19 = vld [vmem:[%s4820_s14 + $0x48] sm:$0xff] }
 0xa1d   :  { %v3783_v27 = vpop.eup %3782  ;;  %v1156_v16 = vpop.permute.xlu0 %1155 }
 0xa1e   :  { %v1055_v26 = vmul.f32 %v3783_v27, %v3779_v24  ;;  %v1171_v56 = vsel %vm1169_vm4, %v1168_v53, %v1156_v16  ;;  %v1320_v24 = vld [vmem:[%s4818_s12 + $0x18] sm:$0xff] }
 0xa1f   :  { %v3785_v36 = vpop.eup %3784  ;;  %v1442_v16 = vld [vmem:[%s4820_s14 + $0x58] sm:$0xff] }
 0xa20   :  { %v1054_v37 = vmul.f32 %v3785_v36, %v3781_v29  ;;  %v1318_v29 = vld [vmem:[%s4818_s12 + $0x8] sm:$0xff]  ;;  %v1438_v53 = vld [vmem:[%s4820_s14 + $0x38] sm:$0xff] }
 0xa22   :  { %3503 = vmatprep.mubr.msk.f32.mxu0 %vm354_vm3, %v1054_v37 }
 0xa23   :  { %3504 = vmatmul.mubr.msk.f32.vlgmr.msra.gmra.mxu0 %vm354_vm3, %v1055_v26  ;;  %v3140_v26 = vld [vmem:[%s4816_s10] ss:$0 sm:$0xff] }
 0xa24   :  { %3507 = vmatpush3.msra.mxu0 %v1182_v38 }
 0xa25   :  { %3508 = vmatprep.subr.mxu0 %v1181_v39 }
 0xa26   :  { %3509 = vmatpush3.msra.mxu0 %v1181_v39 }
 0xa27   :  { %3510 = vmatprep.subr.mxu0 %v1180_v40 }
 0xa28   :  { %3511 = vmatpush3.msra.mxu0 %v1180_v40 }
 0xa29   :  { %3512 = vmatprep.subr.mxu0 %v1179_v41 }
 0xa2a   :  { %3513 = vmatpush3.msra.mxu0 %v1179_v41 }
 0xa2b   :  { %3514 = vmatprep.subr.mxu0 %v1178_v42 }
 0xa2c   :  { %3515 = vmatpush3.msra.mxu0 %v1178_v42  ;;  %v3141_v42 = vld [vmem:[%s4817_s11] ss:$0 sm:$0xff] }
 0xa2d   :  { %3516 = vmatprep.subr.mxu0 %v1177_v43 }
 0xa2e   :  { %3517 = vmatpush3.msra.mxu0 %v1177_v43 }
 0xa2f   :  { %3518 = vmatprep.subr.mxu0 %v1176_v44 }
 0xa30   :  { %3519 = vmatpush3.msra.mxu0 %v1176_v44 }
 0xa31   :  { %3520 = vmatprep.subr.mxu0 %v1175_v45 }
 0xa32   :  { %3521 = vmatpush3.msra.mxu0 %v1175_v45 }
 0xae3   :  { %v3505_v46 = vpop.f32.mrf.mxu0 }
 0xae4   :  { %1163 = vrot.lane.b32.xlu0 %v3505_v46, %s3895_s30  ;;  %v1446_v46 = vld [vmem:[%s4820_s14 + $0x78] sm:$0xff] }
 0xae5   :  { %v1134_v48 = vpop.f32.mrf.mxu0  ;;  %3544 = vmatprep.subr.mxu0 %v1446_v46 }
 0xae6   :  { %1161 = vrot.lane.b32.xlu1 %v1134_v48, %s3895_s30  ;;  %v1445_v48 = vld [vmem:[%s4820_s14 + $0x70] sm:$0xff] }
 0xb56   :  { %v1164_v52 = vpop.permute.xlu0 %1163 }
 0xb57   :  { %v1174_v58 = vsel %vm1172_vm5, %v1171_v56, %v1164_v52  ;;  %v1439_v52 = vld [vmem:[%s4820_s14 + $0x40] sm:$0xff] }
 0xb58   :  { %v1162_v55 = vpop.permute.xlu1 %1161  ;;  %v1435_v56 = vld [vmem:[%s4820_s14 + $0x20] sm:$0xff] }
 0xb59   :  { %v1173_v57 = vsel %vm1172_vm5, %v1170_v54, %v1162_v55  ;;  %v1437_v54 = vld [vmem:[%s4820_s14 + $0x30] sm:$0xff]  ;;  %v1436_v55 = vld [vmem:[%s4820_s14 + $0x28] sm:$0xff] }
 0xb5a   :  { %3522 = vmatprep.mubr.msk.f32.mxu0 %vm191_vm2, %v1173_v57  ;;  %v1434_v57 = vld [vmem:[%s4820_s14 + $0x18] sm:$0xff] }
 0xb5b   :  { %3523 = vmatmul.mubr.msk.f32.vlgmr.msra.gmra.mxu0 %vm191_vm2, %v1174_v58  ;;  %v1433_v58 = vld [vmem:[%s4820_s14 + $0x10] sm:$0xff] }
 0xb5c   :  { %3545 = vmatpush3.msra.mxu0 %v1446_v46 }
 0xb5d   :  { %3546 = vmatprep.subr.mxu0 %v1445_v48 }
 0xb5e   :  { %3547 = vmatpush3.msra.mxu0 %v1445_v48 }
 0xb5f   :  { %3548 = vmatprep.subr.mxu0 %v1444_v49 }
 0xb60   :  { %3549 = vmatpush3.msra.mxu0 %v1444_v49  ;;  %v3162_v49 = vld [vmem:[%s4812_s6 + $0xf0] sm:$0xff] }
 0xb61   :  { %3550 = vmatprep.subr.mxu0 %v1443_v50 }
 0xb62   :  { %3551 = vmatpush3.msra.mxu0 %v1443_v50  ;;  %v3161_v50 = vld [vmem:[%s4812_s6 + $0xe8] sm:$0xff] }
 0xb63   :  { %3552 = vmatprep.subr.mxu0 %v1442_v16 }
 0xb64   :  { %3553 = vmatpush3.msra.mxu0 %v1442_v16  ;;  %v3160_v16 = vld [vmem:[%s4812_s6 + $0xe0] sm:$0xff] }
 0xb65   :  { %3554 = vmatprep.subr.mxu0 %v1441_v51 }
 0xb66   :  { %3555 = vmatpush3.msra.mxu0 %v1441_v51  ;;  %v3159_v51 = vld [vmem:[%s4812_s6 + $0xd8] sm:$0xff] }
 0xb67   :  { %3556 = vmatprep.subr.mxu0 %v1440_v19 }
 0xb68   :  { %3557 = vmatpush3.msra.mxu0 %v1440_v19  ;;  %v3158_v19 = vld [vmem:[%s4812_s6 + $0xd0] sm:$0xff] }
 0xb69   :  { %3558 = vmatprep.subr.mxu0 %v1439_v52 }
 0xb6a   :  { %3559 = vmatpush3.msra.mxu0 %v1439_v52  ;;  %v3157_v52 = vld [vmem:[%s4812_s6 + $0xc8] sm:$0xff] }
 0xb6b   :  { %3560 = vmatprep.subr.mxu0 %v1438_v53 }
 0xb6c   :  { %3561 = vmatpush3.msra.mxu0 %v1438_v53  ;;  %v3156_v53 = vld [vmem:[%s4812_s6 + $0xc0] sm:$0xff] }
 0xb6d   :  { %3562 = vmatprep.subr.mxu0 %v1437_v54 }
 0xb6e   :  { %3563 = vmatpush3.msra.mxu0 %v1437_v54  ;;  %v3155_v54 = vld [vmem:[%s4812_s6 + $0xb8] sm:$0xff] }
 0xb6f   :  { %3564 = vmatprep.subr.mxu0 %v1436_v55 }
 0xb70   :  { %3565 = vmatpush3.msra.mxu0 %v1436_v55  ;;  %v3154_v55 = vld [vmem:[%s4812_s6 + $0xb0] sm:$0xff] }
 0xb71   :  { %3566 = vmatprep.subr.mxu0 %v1435_v56 }
 0xb72   :  { %3567 = vmatpush3.msra.mxu0 %v1435_v56  ;;  %v3153_v56 = vld [vmem:[%s4812_s6 + $0xa8] sm:$0xff] }
 0xb73   :  { %3568 = vmatprep.subr.mxu0 %v1434_v57 }
 0xb74   :  { %3569 = vmatpush3.msra.mxu0 %v1434_v57  ;;  %v3152_v57 = vld [vmem:[%s4812_s6 + $0xa0] sm:$0xff] }
 0xb75   :  { %3570 = vmatprep.subr.mxu0 %v1433_v58 }
 0xb76   :  { %3571 = vmatpush3.msra.mxu0 %v1433_v58  ;;  %v3151_v58 = vld [vmem:[%s4812_s6 + $0x98] sm:$0xff] }
 0xc1b   :  { %v3524_v59 = vpop.f32.mrf.mxu0 }
 0xc1c   :  { %v1268_v60 = vadd.f32 %v3524_v59, %v3137_v63  ;;  %v1431_v59 = vld [vmem:[%s4820_s14] sm:$0xff] }
 0xc1d   :  { %v1262_v61 = vpop.f32.mrf.mxu0 }
 0xc1e   :  { %v1263_v62 = vadd.f32 %v3137_v63, %v1262_v61  ;;  %v1272_v0 = vadd.f32 %v1268_v60, %v4140_v10  ;;  %v1432_v63 = vld [vmem:[%s4820_s14 + $0x8] sm:$0xff]  ;;  %v3142_v60 = vld [vmem:[%s4819_s13] ss:$0 sm:$0xff] }
 0xc1f   :  { %3572 = vmatprep.subr.mxu0 %v1432_v63 }
 0xc20   :  { %v1278_v1 = vsel %vm191_vm2, %v1272_v0, 0.0  ;;  %v1271_v2 = vadd.f32 %v1263_v62, %v4135_v7  ;;  %v1324_v7 = vld [vmem:[%s4818_s12 + $0x38] sm:$0xff]  ;;  %3573 = vmatpush3.msra.mxu0 %v1432_v63  ;;  %v3150_v63 = vld [vmem:[%s4812_s6 + $0x90] sm:$0xff] }
 0xc21   :  { %1279 = vadd.xlane.f32.xlu0 %v1278_v1  ;;  %3525 = vmatprep.subr.mxu1 %v1324_v7 }
 0xc22   :  { %v1275_v3 = vsel %vm191_vm2, %v1271_v2, 0.0  ;;  %3526 = vmatpush3.msra.mxu1 %v1324_v7  ;;  %3574 = vmatprep.subr.mxu0 %v1431_v59 }
 0xc23   :  { %1276 = vadd.xlane.f32.xlu1 %v1275_v3  ;;  %3527 = vmatprep.subr.mxu1 %v1323_v18 }
 0xc24   :  { %3528 = vmatpush3.msra.mxu1 %v1323_v18  ;;  %3575 = vmatpush3.msra.mxu0 %v1431_v59  ;;  %v3149_v59 = vld [vmem:[%s4812_s6 + $0x88] sm:$0xff] }
 0xc25   :  { %3529 = vmatprep.subr.mxu1 %v1322_v22 }
 0xc26   :  { %3530 = vmatpush3.msra.mxu1 %v1322_v22 }
 0xc27   :  { %3531 = vmatprep.subr.mxu1 %v1321_v23 }
 0xc28   :  { %3532 = vmatpush3.msra.mxu1 %v1321_v23 }
 0xc29   :  { %3533 = vmatprep.subr.mxu1 %v1320_v24 }
 0xc2a   :  { %3534 = vmatpush3.msra.mxu1 %v1320_v24 }
 0xc2b   :  { %3535 = vmatprep.subr.mxu1 %v1319_v25 }
 0xc2c   :  { %3536 = vmatpush3.msra.mxu1 %v1319_v25 }
 0xc2d   :  { %3537 = vmatprep.subr.mxu1 %v1318_v29 }
 0xc2e   :  { %3538 = vmatpush3.msra.mxu1 %v1318_v29  ;;  %v3145_v29 = vld [vmem:[%s4821_s15] ss:$0 sm:$0xff] }
 0xc2f   :  { %3539 = vmatprep.subr.mxu1 %v1317_v31 }
 0xc30   :  { %3540 = vmatpush3.msra.mxu1 %v1317_v31 }
 0xcaa   :  { %v1280_v4 = vpop.xlane.xlu0 %1279 }
 0xcab   :  { %v1282_v5 = vmul.f32 0.015625, %v1280_v4 }
 0xcac   :  { %v1277_v6 = vpop.xlane.xlu1 %1276 }
 0xcad   :  { %v1284_v8 = vsub.f32 %v1272_v0, %v1282_v5  ;;  %v1281_v9 = vmul.f32 0.015625, %v1277_v6 }
 0xcaf   :  { %v1283_v13 = vsub.f32 %v1271_v2, %v1281_v9  ;;  %v1286_v14 = vmul.f32 %v1284_v8, %v1284_v8 }
 0xcb1   :  { %v1290_v15 = vsel %vm191_vm2, %v1286_v14, 0.0  ;;  %v1285_v17 = vmul.f32 %v1283_v13, %v1283_v13 }
 0xcb2   :  { %1291 = vadd.xlane.f32.xlu1 %v1290_v15 }
 0xcb3   :  { %v1287_v10 = vsel %vm191_vm2, %v1285_v17, 0.0 }
 0xcb4   :  { %1288 = vadd.xlane.f32.xlu0 %v1287_v10 }
 0xd3b   :  { %v1292_v32 = vpop.xlane.xlu1 %1291 }
 0xd3c   :  { %v1294_v33 = vmul.f32 0.015625, %v1292_v32 }
 0xd3d   :  { %v1289_v34 = vpop.xlane.xlu0 %1288 }
 0xd3e   :  { %v1296_v35 = vadd.f32 1e-12, %v1294_v33  ;;  %v1293_v27 = vmul.f32 0.015625, %v1289_v34 }
 0xd40   :  { %3786 = vrsqrt.f32 %v1296_v35  ;;  %v1295_v36 = vadd.f32 1e-12, %v1293_v27 }
 0xd42   :  { %3788 = vrsqrt.f32 %v1295_v36 }
 0xd4d   :  { %v3787_v37 = vpop.eup %3786 }
 0xd4e   :  { %v1300_v38 = vmul.f32 %v3787_v37, %v1284_v8 }
 0xd4f   :  { %v3789_v39 = vpop.eup %3788 }
 0xd50   :  { %v1299_v40 = vmul.f32 %v3789_v39, %v1283_v13  ;;  %v1308_v41 = vmul.f32 %v3140_v26, %v1300_v38 }
 0xd52   :  { %v1307_v43 = vmul.f32 %v3140_v26, %v1299_v40  ;;  %v4361_v45 = vadd.f32 %v3141_v42, %v1308_v41 }
 0xd54   :  { %v4359_v44 = vadd.f32 %v3141_v42, %v1307_v43 }
 0xd56   :  { %3541 = vmatprep.mubr.msk.f32.mxu1 %vm191_vm2, %v4359_v44 }
 0xd57   :  { %3542 = vmatmul.mubr.msk.f32.vlgmr.msra.gmra.mxu1 %vm191_vm2, %v4361_v45 }
 0xd58   :  { %1675 = vmatprep.mubr.f32.mxu1 %v3893_v47 }
 0xe17   :  { %v3543_v61 = vpop.f32.mrf.mxu1 }
 0xe18   :  { %v1410_v62 = vadd.f32 %v3543_v61, %v3142_v60 }
 0xe19   :  { %v1404_v0 = vpop.f32.mrf.mxu1 }
 0xe1a   :  { %v1414_v1 = vmul.f32 %v1410_v62, %v1410_v62  ;;  %v1405_v2 = vadd.f32 %v3142_v60, %v1404_v0  ;;  %v3148_v60 = vld [vmem:[%s4812_s6 + $0x80] sm:$0xff] }
 0xe1c   :  { %v1416_v3 = vmul.f32 %v1414_v1, %v1410_v62  ;;  %v1413_v4 = vmul.f32 %v1405_v2, %v1405_v2 }
 0xe1e   :  { %v1418_v5 = vmul.f32 0.044715, %v1416_v3  ;;  %v1415_v6 = vmul.f32 %v1413_v4, %v1405_v2 }
 0xe20   :  { %v1420_v8 = vadd.f32 %v1418_v5, %v1410_v62  ;;  %v1417_v9 = vmul.f32 0.044715, %v1415_v6 }
 0xe22   :  { %v1422_v13 = vmul.f32 0.7978846, %v1420_v8  ;;  %v1419_v14 = vadd.f32 %v1417_v9, %v1405_v2  ;;  %v3146_v9 = vld [vmem:[%s4822_s16] ss:$0 sm:$0xff] }
 0xe24   :  { %3790 = vtanh.f32 %v1422_v13  ;;  %v1421_v15 = vmul.f32 0.7978846, %v1419_v14  ;;  %v3147_v14 = vld [vmem:[%s4823_s17] ss:$0 sm:$0xff] }
 0xe26   :  { %3792 = vtanh.f32 %v1421_v15 }
 0xe31   :  { %v3791_v17 = vpop.eup %3790 }
 0xe32   :  { %v1426_v10 = vadd.f32 1.0, %v3791_v17 }
 0xe33   :  { %v3793_v7 = vpop.eup %3792 }
 0xe34   :  { %v1425_v18 = vadd.f32 1.0, %v3793_v7  ;;  %v1428_v22 = vmul.f32 0.5, %v1426_v10  ;;  %v3164_v7 = vld [vmem:[%s4813_s7 + $0x2] sm:$0x3] }
 0xe36   :  { %v1427_v23 = vmul.f32 0.5, %v1425_v18  ;;  %v1430_v25 = vmul.f32 %v1428_v22, %v1410_v62  ;;  %v1598_v18 = vrot.slane %v3164_v7, %v257_v12 }
 0xe38   :  { %v1429_v24 = vmul.f32 %v1427_v23, %v1405_v2 }
 0xe3a   :  { %3576 = vmatprep.mubr.f32.mxu0 %v1429_v24 }
 0xe3b   :  { %3577 = vmatmul.mubr.f32.vlgmr.msra.gmra.mxu0 %v1430_v25 }
 0xefb   :  { %v3578_v31 = vpop.f32.mrf.mxu0 }
 0xefc   :  { %v1526_v32 = vadd.f32 %v3578_v31, %v3145_v29 }
 0xefd   :  { %v1520_v33 = vpop.f32.mrf.mxu0 }
 0xefe   :  { %v1521_v34 = vadd.f32 %v3145_v29, %v1520_v33  ;;  %v1530_v35 = vadd.f32 %v1526_v32, %v4361_v45  ;;  %v1602_v33 = vrot.slane %v3164_v7, %v261_v21 }
 0xf00   :  { %v1536_v27 = vsel %vm191_vm2, %v1530_v35, 0.0  ;;  %v1529_v36 = vadd.f32 %v1521_v34, %v4359_v44  ;;  %v3163_v44 = vld [vmem:[%s4812_s6 + $0xf8] sm:$0xff] }
 0xf01   :  { %1537 = vadd.xlane.f32.xlu1 %v1536_v27  ;;  %1627 = vmatprep.subr.mxu1 %v3163_v44 }
 0xf02   :  { %v1533_v37 = vsel %vm191_vm2, %v1529_v36, 0.0  ;;  %1628 = vmatpush1.msra.mxu1 %v3162_v49 }
 0xf03   :  { %1534 = vadd.xlane.f32.xlu0 %v1533_v37  ;;  %1629 = vmatprep.subr.mxu1 %v3161_v50 }
 0xf04   :  { %1630 = vmatpush1.msra.mxu1 %v3160_v16 }
 0xf05   :  { %1631 = vmatprep.subr.mxu1 %v3159_v51 }
 0xf06   :  { %1632 = vmatpush1.msra.mxu1 %v3158_v19 }
 0xf07   :  { %1633 = vmatprep.subr.mxu1 %v3157_v52 }
 0xf08   :  { %1634 = vmatpush1.msra.mxu1 %v3156_v53 }
 0xf09   :  { %1635 = vmatprep.subr.mxu1 %v3155_v54 }
 0xf0a   :  { %1636 = vmatpush1.msra.mxu1 %v3154_v55 }
 0xf0b   :  { %1637 = vmatprep.subr.mxu1 %v3153_v56 }
 0xf0c   :  { %1638 = vmatpush1.msra.mxu1 %v3152_v57 }
 0xf0d   :  { %1639 = vmatprep.subr.mxu1 %v3151_v58 }
 0xf0e   :  { %1640 = vmatpush1.msra.mxu1 %v3150_v63  ;;  %v4551_v63 = vld [vmem:[%s4842_s0 + $0x8] sm:$0xff] }
 0xf0f   :  { %1641 = vmatprep.subr.mxu1 %v3149_v59 }
 0xf10   :  { %1642 = vmatpush1.msra.mxu1 %v3148_v60 }
 0xf8a   :  { %v1538_v26 = vpop.xlane.xlu1 %1537 }
 0xf8b   :  { %v1540_v38 = vmul.f32 0.015625, %v1538_v26 }
 0xf8c   :  { %v1535_v39 = vpop.xlane.xlu0 %1534 }
 0xf8d   :  { %v1542_v40 = vsub.f32 %v1530_v35, %v1540_v38  ;;  %v1539_v41 = vmul.f32 0.015625, %v1535_v39 }
 0xf8f   :  { %v1541_v42 = vsub.f32 %v1529_v36, %v1539_v41  ;;  %v1544_v43 = vmul.f32 %v1542_v40, %v1542_v40 }
 0xf91   :  { %v1548_v46 = vsel %vm191_vm2, %v1544_v43, 0.0  ;;  %v1543_v48 = vmul.f32 %v1541_v42, %v1541_v42 }
 0xf92   :  { %1549 = vadd.xlane.f32.xlu1 %v1548_v46 }
 0xf93   :  { %v1545_v45 = vsel %vm191_vm2, %v1543_v48, 0.0 }
 0xf94   :  { %1546 = vadd.xlane.f32.xlu0 %v1545_v45 }
0x101b   :  { %v1550_v61 = vpop.xlane.xlu1 %1549 }
0x101c   :  { %v1552_v62 = vmul.f32 0.015625, %v1550_v61  ;;  %v4557_v61 = vld [vmem:[%s4842_s0] sm:$0xff]  ;;  %s4843_s0 = smov 80  }
0x101d   :  { %v1547_v0 = vpop.xlane.xlu0 %1546 }
0x101e   :  { %v1554_v1 = vadd.f32 1e-12, %v1552_v62  ;;  %v1551_v2 = vmul.f32 0.015625, %v1547_v0 }
0x1020   :  { %3794 = vrsqrt.f32 %v1554_v1  ;;  %v1553_v3 = vadd.f32 1e-12, %v1551_v2 }
0x1022   :  { %3796 = vrsqrt.f32 %v1553_v3 }
0x102d   :  { %v3795_v4 = vpop.eup %3794 }
0x102e   :  { %v1558_v8 = vmul.f32 %v3795_v4, %v1542_v40 }
0x102f   :  { %v3797_v5 = vpop.eup %3796 }
0x1030   :  { %v1557_v6 = vmul.f32 %v3797_v5, %v1541_v42  ;;  %v1566_v17 = vmul.f32 %v3146_v9, %v1558_v8 }
0x1032   :  { %v1565_v13 = vmul.f32 %v3146_v9, %v1557_v6  ;;  %v4487_v10 = vadd.f32 %v3147_v14, %v1566_v17 }
0x1034   :  { %v4482_v15 = vadd.f32 %v3147_v14, %v1565_v13 }
0x1036   :  { %3165 = vmatmul.mubr.msk.f32.vlgmr.msra.gmra.mxu1 %vm191_vm2, %v4482_v15 }
0x1037   :  { %1681 = vmatprep.mubr.f32.mxu1 %v3893_v47 }
0x103a   :  { %3166 = vmatmul.mubr.msk.f32.gmra.mxu1 %vm191_vm2, %v4487_v10 }
0x10f6   :  { %v1677_v22 = vpop.f32.mrf.mxu1 }
0x10f7   :  { %v4496_v23 = vadd.f32 %v1677_v22, %v1598_v18 }
0x10f8   :  { %v1679_v24 = vpop.f32.mrf.mxu1 }
0x10f9   :  { %1690 = vrot.lane.b32.xlu1 %v4496_v23, %s3894_s28  ;;  %3583 = vmatprep.mubr.msk.f32.mxu1 %vm354_vm3, %v4496_v23  ;;  %v4515_v35 = vadd.f32 %v1679_v24, %v1602_v33 }
0x10fa   :  { %v1683_v25 = vpop.f32.mrf.mxu1 }
0x10fb   :  { %v4502_v29 = vadd.f32 %v1683_v25, %v1598_v18 }
0x10fc   :  { %v1685_v12 = vpop.f32.mrf.mxu1 }
0x10fd   :  { %1692 = vrot.lane.b32.xlu0 %v4502_v29, %s3894_s28  ;;  %v4511_v34 = vadd.f32 %v1685_v12, %v1602_v33 }
0x116b   :  { %v1691_v32 = vpop.permute.xlu1 %1690 }
0x116f   :  { %v1693_v31 = vpop.permute.xlu0 %1692 }
0x1170   :  { %3579 = vmatprep.subr.msk.mxu1 %vm354_vm3, %v1693_v31 }
0x1171   :  { %3580 = vmatpush3.xpose.msk.msra.mxu1 %vm354_vm3, %v1693_v31 }
0x1172   :  { %3581 = vmatprep.subr.msk.mxu1 %vm354_vm3, %v1691_v32 }
0x1175   :  { %3582 = vmatpush3.xpose.msk.msra.mxu1 %vm354_vm3, %v1691_v32 }
0x1176   :  { %3586 = vmatprep.subr.mxu1 %v4511_v34 }
0x1178   :  { %3584 = vmatmul.mubr.msk.f32.vlgmr.msra.gmra.mxu1 %vm354_vm3, %v4502_v29 }
0x1179   :  { %3587 = vmatpush3.msra.mxu1 %v4511_v34 }
0x117a   :  { %3588 = vmatprep.subr.mxu1 %v4515_v35 }
0x117b   :  { %3589 = vmatpush3.msra.mxu1 %v4515_v35 }
0x1238   :  { %v3585_v21 = vpop.f32.mrf.mxu1 }
0x1239   :  { %v1774_v27 = vadd.f32 %v3585_v21, %v4183_v28 }
0x123a   :  { %v1768_v36 = vpop.f32.mrf.mxu1 }
0x123b   :  { %v1769_v37 = vadd.f32 %v1768_v36, %v4188_v30  ;;  %v1780_v26 = vsel %vm354_vm3, %v1774_v27, -inf }
0x123c   :  { %1781 = vmax.xlane.f32.xlu0 %v1780_v26 }
0x123d   :  { %v1777_v38 = vsel %vm354_vm3, %v1769_v37, -inf }
0x123e   :  { %1778 = vmax.xlane.f32.xlu1 %v1777_v38 }
0x12c5   :  { %v1782_v39 = vpop.xlane.xlu0 %1781 }
0x12c6   :  { %v1784_v40 = vsub.f32 %v1774_v27, %v1782_v39 }
0x12c7   :  { %v1779_v41 = vpop.xlane.xlu1 %1778 }
0x12c8   :  { %v1787_v42 = vmul.f32 1.442695, %v1784_v40  ;;  %v1783_v43 = vsub.f32 %v1769_v37, %v1779_v41 }
0x12ca   :  { %3798 = vpow2.f32 %v1787_v42  ;;  %v1785_v46 = vmul.f32 1.442695, %v1783_v43 }
0x12cc   :  { %3800 = vpow2.f32 %v1785_v46 }
0x12d7   :  { %v3799_v48 = vpop.eup %3798 }
0x12d8   :  { %v1792_v28 = vsel %vm354_vm3, %v3799_v48, 0.0 }
0x12d9   :  { %v3801_v45 = vpop.eup %3800  ;;  %1793 = vadd.xlane.f32.xlu1 %v1792_v28 }
0x12da   :  { %v1789_v30 = vsel %vm354_vm3, %v3801_v45, 0.0 }
0x12db   :  { %1790 = vadd.xlane.f32.xlu0 %v1789_v30 }
0x12ea   :  { %1884 = vrot.lane.b32.xlu1 %v4496_v23, %s3895_s30 }
0x12ee   :  { %1880 = vrot.lane.b32.xlu1 %v4496_v23, %s3898_s23 }
0x12f1   :  { %1886 = vrot.lane.b32.xlu0 %v4502_v29, %s3895_s30 }
0x12f5   :  { %1882 = vrot.lane.b32.xlu0 %v4502_v29, %s3898_s23 }
0x1362   :  { %v1794_v44 = vpop.xlane.xlu1 %1793 }
0x1363   :  { %3802 = vrcp.f32 %v1794_v44 }
0x1364   :  { %v1791_v49 = vpop.xlane.xlu0 %1790 }
0x1365   :  { %3804 = vrcp.f32 %v1791_v49 }
0x1366   :  { %v1885_v16 = vpop.permute.xlu1 %1884 }
0x1368   :  { %v1887_v50 = vpop.permute.xlu0 %1886 }
0x1369   :  { %3593 = vmatprep.subr.msk.mxu1 %vm354_vm3, %v1887_v50 }
0x136a   :  { %v1881_v54 = vpop.permute.xlu1 %1880 }
0x136c   :  { %v1883_v55 = vpop.permute.xlu0 %1882 }
0x1370   :  { %v3803_v51 = vpop.eup %3802 }
0x1371   :  { %v1798_v53 = vmul.f32 %v3803_v51, %v3799_v48 }
0x1372   :  { %v3805_v19 = vpop.eup %3804 }
0x1373   :  { %v1797_v52 = vmul.f32 %v3805_v19, %v3801_v45 }
0x1375   :  { %3590 = vmatprep.mubr.msk.f32.mxu1 %vm354_vm3, %v1797_v52 }
0x1376   :  { %3591 = vmatmul.mubr.msk.f32.vlgmr.msra.gmra.mxu1 %vm354_vm3, %v1798_v53 }
0x1377   :  { %3594 = vmatpush3.xpose.msk.msra.mxu1 %vm354_vm3, %v1887_v50  ;;  %3597 = vmatprep.mubr.msk.f32.mxu1 %vm354_vm3, %v1881_v54 }
0x1378   :  { %3595 = vmatprep.subr.msk.mxu1 %vm354_vm3, %v1885_v16 }
0x137b   :  { %3596 = vmatpush3.xpose.msk.msra.mxu1 %vm354_vm3, %v1885_v16 }
0x137e   :  { %3598 = vmatmul.mubr.msk.f32.vlgmr.msra.gmra.mxu1 %vm354_vm3, %v1883_v55 }
0x1436   :  { %v4544_v56 = vpop.f32.mrf.mxu1 }
0x1438   :  { %v4546_v57 = vpop.f32.mrf.mxu1 }
0x143e   :  { %v3599_v58 = vpop.f32.mrf.mxu1 }
0x143f   :  { %v1968_v59 = vadd.f32 %v4551_v63, %v3599_v58 }
0x1440   :  { %v1962_v60 = vpop.f32.mrf.mxu1 }
0x1441   :  { %v1963_v62 = vadd.f32 %v4557_v61, %v1962_v60  ;;  %v1974_v0 = vsel %vm354_vm3, %v1968_v59, -inf }
0x1442   :  { %1975 = vmax.xlane.f32.xlu0 %v1974_v0 }
0x1443   :  { %v1971_v1 = vsel %vm354_vm3, %v1963_v62, -inf }
0x1444   :  { %1972 = vmax.xlane.f32.xlu1 %v1971_v1 }
0x14cb   :  { %v1976_v2 = vpop.xlane.xlu0 %1975 }
0x14cc   :  { %v1978_v3 = vsub.f32 %v1968_v59, %v1976_v2 }
0x14cd   :  { %v1973_v4 = vpop.xlane.xlu1 %1972 }
0x14ce   :  { %v1981_v5 = vmul.f32 1.442695, %v1978_v3  ;;  %v1977_v6 = vsub.f32 %v1963_v62, %v1973_v4 }
0x14d0   :  { %3806 = vpow2.f32 %v1981_v5  ;;  %v1979_v8 = vmul.f32 1.442695, %v1977_v6 }
0x14d2   :  { %3808 = vpow2.f32 %v1979_v8 }
0x14dd   :  { %v3807_v9 = vpop.eup %3806 }
0x14de   :  { %v1986_v13 = vsel %vm354_vm3, %v3807_v9, 0.0 }
0x14df   :  { %v3809_v14 = vpop.eup %3808  ;;  %1987 = vadd.xlane.f32.xlu1 %v1986_v13 }
0x14e0   :  { %v1983_v17 = vsel %vm354_vm3, %v3809_v14, 0.0 }
0x14e1   :  { %1984 = vadd.xlane.f32.xlu0 %v1983_v17 }
0x14f0   :  { %1995 = vrot.lane.b32.xlu1 %v4515_v35, %s3898_s23 }
0x14f4   :  { %2088 = vrot.lane.b32.xlu1 %v4502_v29, %s3897_s22 }
0x14f7   :  { %1997 = vrot.lane.b32.xlu0 %v4511_v34, %s3898_s23 }
0x14f8   :  { %2082 = vrot.lane.b32.xlu1 %v4496_v23, %s3896_s18 }
0x14fb   :  { %2086 = vrot.lane.b32.xlu0 %v4496_v23, %s3897_s22 }
0x14ff   :  { %2084 = vrot.lane.b32.xlu0 %v4502_v29, %s3896_s18 }
0x1568   :  { %v1988_v7 = vpop.xlane.xlu1 %1987 }
0x1569   :  { %3810 = vrcp.f32 %v1988_v7 }
0x156a   :  { %v1985_v18 = vpop.xlane.xlu0 %1984 }
0x156b   :  { %3812 = vrcp.f32 %v1985_v18 }
0x156c   :  { %v1996_v22 = vpop.permute.xlu1 %1995 }
0x156e   :  { %v1998_v24 = vpop.permute.xlu0 %1997 }
0x156f   :  { %3600 = vmatprep.subr.mxu0 %v1998_v24 }
0x1570   :  { %3601 = vmatpush3.msra.mxu0 %v1998_v24  ;;  %v2089_v25 = vpop.permute.xlu1 %2088 }
0x1571   :  { %3602 = vmatprep.subr.mxu0 %v1996_v22 }
0x1572   :  { %3603 = vmatpush3.msra.mxu0 %v1996_v22  ;;  %v2087_v27 = vpop.permute.xlu0 %2086 }
0x1573   :  { %3607 = vmatprep.subr.msk.mxu0 %vm354_vm3, %v2089_v25 }
0x1574   :  { %v2083_v21 = vpop.permute.xlu1 %2082 }
0x1576   :  { %v3811_v31 = vpop.eup %3810  ;;  %v2085_v36 = vpop.permute.xlu0 %2084 }
0x1577   :  { %v1992_v33 = vmul.f32 %v3811_v31, %v3807_v9 }
0x1578   :  { %v3813_v12 = vpop.eup %3812 }
0x1579   :  { %v1991_v32 = vmul.f32 %v3813_v12, %v3809_v14 }
0x157b   :  { %3604 = vmatprep.mubr.msk.f32.mxu0 %vm354_vm3, %v1991_v32 }
0x157c   :  { %3605 = vmatmul.mubr.msk.f32.vlgmr.msra.gmra.mxu0 %vm354_vm3, %v1992_v33 }
0x157d   :  { %3608 = vmatpush3.xpose.msk.msra.mxu0 %vm354_vm3, %v2089_v25  ;;  %3611 = vmatprep.mubr.msk.f32.mxu0 %vm354_vm3, %v2083_v21 }
0x157e   :  { %3609 = vmatprep.subr.msk.mxu0 %vm354_vm3, %v2087_v27 }
0x1581   :  { %3610 = vmatpush3.xpose.msk.msra.mxu0 %vm354_vm3, %v2087_v27 }
0x1584   :  { %3612 = vmatmul.mubr.msk.f32.vlgmr.msra.gmra.mxu0 %vm354_vm3, %v2085_v36  ;;  %v3198_v36 = vld [vmem:[%s4814_s8 + $0x78] sm:$0xff] }
0x163c   :  { %v4584_v37 = vpop.f32.mrf.mxu0 }
0x163e   :  { %v4586_v26 = vpop.f32.mrf.mxu0 }
0x1644   :  { %v3613_v38 = vpop.f32.mrf.mxu0 }
0x1645   :  { %v2170_v39 = vadd.f32 %v4551_v63, %v3613_v38  ;;  %v3195_v38 = vld [vmem:[%s4814_s8 + $0x60] sm:$0xff] }
0x1646   :  { %v2164_v40 = vpop.f32.mrf.mxu0 }
0x1647   :  { %v2165_v41 = vadd.f32 %v4557_v61, %v2164_v40  ;;  %v2176_v42 = vsel %vm354_vm3, %v2170_v39, -inf  ;;  %v3193_v40 = vld [vmem:[%s4814_s8 + $0x50] sm:$0xff] }
0x1648   :  { %2177 = vmax.xlane.f32.xlu0 %v2176_v42  ;;  %v3191_v42 = vld [vmem:[%s4814_s8 + $0x40] sm:$0xff] }
0x1649   :  { %v2173_v43 = vsel %vm354_vm3, %v2165_v41, -inf }
0x164a   :  { %2174 = vmax.xlane.f32.xlu1 %v2173_v43 }
0x16d1   :  { %v2178_v46 = vpop.xlane.xlu0 %2177 }
0x16d2   :  { %v2180_v48 = vsub.f32 %v2170_v39, %v2178_v46  ;;  %v3194_v39 = vld [vmem:[%s4814_s8 + $0x58] sm:$0xff] }
0x16d3   :  { %v2175_v28 = vpop.xlane.xlu1 %2174 }
0x16d4   :  { %v2183_v45 = vmul.f32 1.442695, %v2180_v48  ;;  %v2179_v30 = vsub.f32 %v2165_v41, %v2175_v28  ;;  %v3192_v41 = vld [vmem:[%s4814_s8 + $0x48] sm:$0xff] }
0x16d6   :  { %3814 = vpow2.f32 %v2183_v45  ;;  %v2181_v44 = vmul.f32 1.442695, %v2179_v30 }
0x16d8   :  { %3816 = vpow2.f32 %v2181_v44 }
0x16e3   :  { %v3815_v49 = vpop.eup %3814 }
0x16e4   :  { %v2188_v50 = vsel %vm354_vm3, %v3815_v49, 0.0 }
0x16e5   :  { %v3817_v16 = vpop.eup %3816  ;;  %2189 = vadd.xlane.f32.xlu1 %v2188_v50 }
0x16e6   :  { %v2185_v51 = vsel %vm354_vm3, %v3817_v16, 0.0 }
0x16e7   :  { %2186 = vadd.xlane.f32.xlu0 %v2185_v51 }
0x16f6   :  { %2195 = vrot.lane.b32.xlu1 %v4515_v35, %s3896_s18 }
0x16fa   :  { %2288 = vrot.lane.b32.xlu1 %v4502_v29, %s3899_s24 }
0x16fd   :  { %2197 = vrot.lane.b32.xlu0 %v4511_v34, %s3896_s18 }
0x16fe   :  { %2282 = vrot.lane.b32.xlu1 %v4496_v23, %s4843_s0 }
0x1701   :  { %2286 = vrot.lane.b32.xlu0 %v4496_v23, %s3899_s24 }
0x1705   :  { %2284 = vrot.lane.b32.xlu0 %v4502_v29, %s4843_s0 }
0x176e   :  { %v2190_v19 = vpop.xlane.xlu1 %2189 }
0x176f   :  { %3818 = vrcp.f32 %v2190_v19 }
0x1770   :  { %v2187_v52 = vpop.xlane.xlu0 %2186 }
0x1771   :  { %3820 = vrcp.f32 %v2187_v52 }
0x1772   :  { %v2196_v53 = vpop.permute.xlu1 %2195 }
0x1774   :  { %v2198_v54 = vpop.permute.xlu0 %2197 }
0x1775   :  { %3614 = vmatprep.subr.mxu1 %v2198_v54 }
0x1776   :  { %3615 = vmatpush3.msra.mxu1 %v2198_v54  ;;  %v2289_v55 = vpop.permute.xlu1 %2288 }
0x1777   :  { %3616 = vmatprep.subr.mxu1 %v2196_v53 }
0x1778   :  { %3617 = vmatpush3.msra.mxu1 %v2196_v53  ;;  %v2287_v62 = vpop.permute.xlu0 %2286 }
0x1779   :  { %3621 = vmatprep.subr.msk.mxu1 %vm354_vm3, %v2289_v55 }
0x177a   :  { %v2283_v29 = vpop.permute.xlu1 %2282 }
0x177c   :  { %v3819_v58 = vpop.eup %3818  ;;  %v2285_v0 = vpop.permute.xlu0 %2284 }
0x177d   :  { %v2194_v23 = vmul.f32 %v3819_v58, %v3815_v49 }
0x177e   :  { %v3821_v59 = vpop.eup %3820 }
0x177f   :  { %v2193_v60 = vmul.f32 %v3821_v59, %v3817_v16 }
0x1781   :  { %3618 = vmatprep.mubr.msk.f32.mxu1 %vm354_vm3, %v2193_v60 }
0x1782   :  { %3619 = vmatmul.mubr.msk.f32.vlgmr.msra.gmra.mxu1 %vm354_vm3, %v2194_v23 }
0x1783   :  { %3622 = vmatpush3.xpose.msk.msra.mxu1 %vm354_vm3, %v2289_v55  ;;  %3625 = vmatprep.mubr.msk.f32.mxu1 %vm354_vm3, %v2283_v29 }
0x1784   :  { %3623 = vmatprep.subr.msk.mxu1 %vm354_vm3, %v2287_v62 }
0x1787   :  { %3624 = vmatpush3.xpose.msk.msra.mxu1 %vm354_vm3, %v2287_v62 }
0x178a   :  { %3626 = vmatmul.mubr.msk.f32.vlgmr.msra.gmra.mxu1 %vm354_vm3, %v2285_v0 }
0x1842   :  { %v3620_v1 = vpop.f32.mrf.mxu1 }
0x1844   :  { %v2273_v2 = vpop.f32.mrf.mxu1 }
0x184a   :  { %v3627_v3 = vpop.f32.mrf.mxu1 }
0x184b   :  { %v2370_v4 = vadd.f32 %v4551_v63, %v3627_v3 }
0x184c   :  { %v2364_v5 = vpop.f32.mrf.mxu1 }
0x184d   :  { %v2365_v6 = vadd.f32 %v4557_v61, %v2364_v5  ;;  %v2376_v8 = vsel %vm354_vm3, %v2370_v4, -inf }
0x184e   :  { %2377 = vmax.xlane.f32.xlu0 %v2376_v8 }
0x184f   :  { %v2373_v9 = vsel %vm354_vm3, %v2365_v6, -inf }
0x1850   :  { %2374 = vmax.xlane.f32.xlu1 %v2373_v9  ;;  %v3213_v9 = vld [vmem:[%s4818_s12 + $0x70] sm:$0xff] }
0x18d7   :  { %v2378_v13 = vpop.xlane.xlu0 %2377 }
0x18d8   :  { %v2380_v14 = vsub.f32 %v2370_v4, %v2378_v13  ;;  %v3212_v13 = vld [vmem:[%s4818_s12 + $0x68] sm:$0xff] }
0x18d9   :  { %v2375_v17 = vpop.xlane.xlu1 %2374 }
0x18da   :  { %v2383_v7 = vmul.f32 1.442695, %v2380_v14  ;;  %v2379_v18 = vsub.f32 %v2365_v6, %v2375_v17  ;;  %v3211_v14 = vld [vmem:[%s4818_s12 + $0x60] sm:$0xff]  ;;  %v3210_v17 = vld [vmem:[%s4818_s12 + $0x58] sm:$0xff] }
0x18dc   :  { %3822 = vpow2.f32 %v2383_v7  ;;  %v2381_v22 = vmul.f32 1.442695, %v2379_v18  ;;  %v3209_v7 = vld [vmem:[%s4818_s12 + $0x50] sm:$0xff]  ;;  %v3208_v18 = vld [vmem:[%s4818_s12 + $0x48] sm:$0xff] }
0x18de   :  { %3824 = vpow2.f32 %v2381_v22  ;;  %v3207_v22 = vld [vmem:[%s4818_s12 + $0x40] sm:$0xff] }
0x18e9   :  { %v3823_v24 = vpop.eup %3822 }
0x18ea   :  { %v2388_v63 = vsel %vm354_vm3, %v3823_v24, 0.0 }
0x18eb   :  { %v3825_v25 = vpop.eup %3824  ;;  %2389 = vadd.xlane.f32.xlu1 %v2388_v63 }
0x18ec   :  { %v2385_v61 = vsel %vm354_vm3, %v3825_v25, 0.0 }
0x18ed   :  { %2386 = vadd.xlane.f32.xlu0 %v2385_v61 }
0x18fc   :  { %2395 = vrot.lane.b32.xlu1 %v4515_v35, %s4843_s0 }
0x1900   :  { %2484 = vrot.lane.b32.xlu1 %v4586_v26, %s3899_s24  ;;  %v3196_v26 = vld [vmem:[%s4814_s8 + $0x68] sm:$0xff] }
0x1903   :  { %2397 = vrot.lane.b32.xlu0 %v4511_v34, %s4843_s0 }
0x1904   :  { %2492 = vrot.lane.b32.xlu1 %v2273_v2, %s3897_s22 }
0x1907   :  { %2486 = vrot.lane.b32.xlu0 %v4584_v37, %s3899_s24  ;;  %v3197_v37 = vld [vmem:[%s4814_s8 + $0x70] sm:$0xff] }
0x190b   :  { %2494 = vrot.lane.b32.xlu0 %v3620_v1, %s3897_s22 }
0x1974   :  { %v2390_v31 = vpop.xlane.xlu1 %2389 }
0x1975   :  { %3826 = vrcp.f32 %v2390_v31 }
0x1976   :  { %v2387_v12 = vpop.xlane.xlu0 %2386 }
0x1977   :  { %3828 = vrcp.f32 %v2387_v12 }
0x1978   :  { %v2396_v35 = vpop.permute.xlu1 %2395 }
0x197a   :  { %v2398_v32 = vpop.permute.xlu0 %2397 }
0x197b   :  { %3628 = vmatprep.subr.mxu0 %v2398_v32 }
0x197c   :  { %3629 = vmatpush3.msra.mxu0 %v2398_v32  ;;  %v2485_v28 = vpop.permute.xlu1 %2484 }
0x197d   :  { %3630 = vmatprep.subr.mxu0 %v2396_v35  ;;  %v2506_v44 = vsel %vm354_vm3, %v4546_v57, %v2485_v28  ;;  %v3200_v57 = vld [vmem:[%s4815_s9 + $0x1] ss:$0 sm:$0xff] }
0x197e   :  { %3631 = vmatpush3.msra.mxu0 %v2396_v35  ;;  %v2487_v48 = vpop.permute.xlu0 %2486  ;;  %v3205_v35 = vld [vmem:[%s4816_s10 + $0x1] ss:$0 sm:$0xff] }
0x197f   :  { %3635 = vmatprep.subr.mxu0 %v3198_v36  ;;  %v2507_v50 = vsel %vm354_vm3, %v4544_v56, %v2487_v48  ;;  %v3228_v48 = vld [vmem:[%s4820_s14 + $0xc8] sm:$0xff]  ;;  %v3227_v28 = vld [vmem:[%s4820_s14 + $0xc0] sm:$0xff] }
0x1980   :  { %v2493_v30 = vpop.permute.xlu1 %2492 }
0x1981   :  { %v2508_v16 = vsel %vm1169_vm4, %v2506_v44, %v2493_v30  ;;  %v3225_v30 = vld [vmem:[%s4820_s14 + $0xb0] sm:$0xff]  ;;  %v3224_v44 = vld [vmem:[%s4820_s14 + $0xa8] sm:$0xff] }
0x1982   :  { %v3827_v33 = vpop.eup %3826  ;;  %v2495_v45 = vpop.permute.xlu0 %2494 }
0x1983   :  { %v2394_v27 = vmul.f32 %v3827_v33, %v3823_v24  ;;  %v2509_v19 = vsel %vm1169_vm4, %v2507_v50, %v2495_v45  ;;  %v3226_v45 = vld [vmem:[%s4820_s14 + $0xb8] sm:$0xff] }
0x1984   :  { %v3829_v21 = vpop.eup %3828  ;;  %v3222_v50 = vld [vmem:[%s4820_s14 + $0x98] sm:$0xff] }
0x1985   :  { %v2393_v34 = vmul.f32 %v3829_v21, %v3825_v25 }
0x1987   :  { %3632 = vmatprep.mubr.msk.f32.mxu0 %vm354_vm3, %v2393_v34 }
0x1988   :  { %3633 = vmatmul.mubr.msk.f32.vlgmr.msra.gmra.mxu0 %vm354_vm3, %v2394_v27 }
0x1989   :  { %3636 = vmatpush3.msra.mxu0 %v3198_v36  ;;  %v3206_v36 = vld [vmem:[%s4817_s11 + $0x1] ss:$0 sm:$0xff] }
0x198a   :  { %3637 = vmatprep.subr.mxu0 %v3197_v37 }
0x198b   :  { %3638 = vmatpush3.msra.mxu0 %v3197_v37 }
0x198c   :  { %3639 = vmatprep.subr.mxu0 %v3196_v26 }
0x198d   :  { %3640 = vmatpush3.msra.mxu0 %v3196_v26 }
0x198e   :  { %3641 = vmatprep.subr.mxu0 %v3195_v38 }
0x198f   :  { %3642 = vmatpush3.msra.mxu0 %v3195_v38 }
0x1990   :  { %3643 = vmatprep.subr.mxu0 %v3194_v39 }
0x1991   :  { %3644 = vmatpush3.msra.mxu0 %v3194_v39  ;;  %v3234_v39 = vld [vmem:[%s4820_s14 + $0xf8] sm:$0xff] }
0x1992   :  { %3645 = vmatprep.subr.mxu0 %v3193_v40 }
0x1993   :  { %3646 = vmatpush3.msra.mxu0 %v3193_v40  ;;  %v3233_v40 = vld [vmem:[%s4820_s14 + $0xf0] sm:$0xff] }
0x1994   :  { %3647 = vmatprep.subr.mxu0 %v3192_v41 }
0x1995   :  { %3648 = vmatpush3.msra.mxu0 %v3192_v41  ;;  %v3232_v41 = vld [vmem:[%s4820_s14 + $0xe8] sm:$0xff] }
0x1996   :  { %3649 = vmatprep.subr.mxu0 %v3191_v42 }
0x1997   :  { %3650 = vmatpush3.msra.mxu0 %v3191_v42  ;;  %v3231_v42 = vld [vmem:[%s4820_s14 + $0xe0] sm:$0xff] }
0x1998   :  { %3673 = vmatprep.subr.mxu0 %v3234_v39 }
0x1a48   :  { %v3634_v43 = vpop.f32.mrf.mxu0 }
0x1a49   :  { %2502 = vrot.lane.b32.xlu0 %v3634_v43, %s3895_s30  ;;  %v3230_v43 = vld [vmem:[%s4820_s14 + $0xd8] sm:$0xff] }
0x1a4a   :  { %v2473_v46 = vpop.f32.mrf.mxu0 }
0x1a4b   :  { %2500 = vrot.lane.b32.xlu1 %v2473_v46, %s3895_s30  ;;  %v3229_v46 = vld [vmem:[%s4820_s14 + $0xd0] sm:$0xff] }
0x1abb   :  { %v2503_v49 = vpop.permute.xlu0 %2502 }
0x1abc   :  { %v2511_v53 = vsel %vm1172_vm5, %v2509_v19, %v2503_v49  ;;  %v3223_v49 = vld [vmem:[%s4820_s14 + $0xa0] sm:$0xff] }
0x1abd   :  { %v2501_v51 = vpop.permute.xlu1 %2500  ;;  %v3219_v19 = vld [vmem:[%s4820_s14 + $0x80] sm:$0xff] }
0x1abe   :  { %v2510_v52 = vsel %vm1172_vm5, %v2508_v16, %v2501_v51  ;;  %v3221_v16 = vld [vmem:[%s4820_s14 + $0x90] sm:$0xff]  ;;  %v3220_v51 = vld [vmem:[%s4820_s14 + $0x88] sm:$0xff] }
0x1abf   :  { %3651 = vmatprep.mubr.msk.f32.mxu0 %vm191_vm2, %v2510_v52  ;;  %v3216_v52 = vld [vmem:[%s4819_s13 + $0x1] ss:$0 sm:$0xff] }
0x1ac0   :  { %3652 = vmatmul.mubr.msk.f32.vlgmr.msra.gmra.mxu0 %vm191_vm2, %v2511_v53 }
0x1ac1   :  { %3674 = vmatpush3.msra.mxu0 %v3234_v39 }
0x1ac2   :  { %3675 = vmatprep.subr.mxu0 %v3233_v40 }
0x1ac3   :  { %3676 = vmatpush3.msra.mxu0 %v3233_v40 }
0x1ac4   :  { %3677 = vmatprep.subr.mxu0 %v3232_v41 }
0x1ac5   :  { %3678 = vmatpush3.msra.mxu0 %v3232_v41 }
0x1ac6   :  { %3679 = vmatprep.subr.mxu0 %v3231_v42 }
0x1ac7   :  { %3680 = vmatpush3.msra.mxu0 %v3231_v42 }
0x1ac8   :  { %3681 = vmatprep.subr.mxu0 %v3230_v43 }
0x1ac9   :  { %3682 = vmatpush3.msra.mxu0 %v3230_v43  ;;  %v3239_v43 = vld [vmem:[%s4822_s16 + $0x1] ss:$0 sm:$0xff] }
0x1aca   :  { %3683 = vmatprep.subr.mxu0 %v3229_v46 }
0x1acb   :  { %3684 = vmatpush3.msra.mxu0 %v3229_v46  ;;  %v2924_v46 = vmul.u32 8, %v4145_v11  ;;  %v3007_v11 = vld [vmem:[#allocation2 + $0x30] sm:$0xff] }
0x1acc   :  { %3685 = vmatprep.subr.mxu0 %v3228_v48 }
0x1acd   :  { %3686 = vmatpush3.msra.mxu0 %v3228_v48  ;;  %vm2925_vm7 = vcmp.eq.s32.totalorder %v4066_v20, %v2924_v46  ;;  %v3006_v20 = vld [vmem:[#allocation2 + $0x28] sm:$0xff] }
0x1ace   :  { %3687 = vmatprep.subr.mxu0 %v3227_v28 }
0x1acf   :  { %3688 = vmatpush3.msra.mxu0 %v3227_v28 }
0x1ad0   :  { %3689 = vmatprep.subr.mxu0 %v3226_v45 }
0x1ad1   :  { %3690 = vmatpush3.msra.mxu0 %v3226_v45  ;;  %v3240_v45 = vld [vmem:[%s4823_s17 + $0x1] ss:$0 sm:$0xff] }
0x1ad2   :  { %3691 = vmatprep.subr.mxu0 %v3225_v30 }
0x1ad3   :  { %3692 = vmatpush3.msra.mxu0 %v3225_v30 }
0x1ad4   :  { %3693 = vmatprep.subr.mxu0 %v3224_v44 }
0x1ad5   :  { %3694 = vmatpush3.msra.mxu0 %v3224_v44 }
0x1ad6   :  { %3695 = vmatprep.subr.mxu0 %v3223_v49 }
0x1ad7   :  { %3696 = vmatpush3.msra.mxu0 %v3223_v49 }
0x1ad8   :  { %3697 = vmatprep.subr.mxu0 %v3222_v50 }
0x1ad9   :  { %3698 = vmatpush3.msra.mxu0 %v3222_v50 }
0x1ada   :  { %3699 = vmatprep.subr.mxu0 %v3221_v16 }
0x1adb   :  { %3700 = vmatpush3.msra.mxu0 %v3221_v16 }
0x1adc   :  { %3701 = vmatprep.subr.mxu0 %v3220_v51 }
0x1add   :  { %3702 = vmatpush3.msra.mxu0 %v3220_v51  ;;  %v3241_v51 = vsel %vm2925_vm7, 1.0, %v3893_v47 }
0x1ade   :  { %3703 = vmatprep.subr.mxu0 %v3219_v19 }
0x1adf   :  { %3704 = vmatpush3.msra.mxu0 %v3219_v19  ;;  %v3008_v19 = vld [vmem:[#allocation2 + $0x38] sm:$0xff] }
0x1b80   :  { %v3653_v54 = vpop.f32.mrf.mxu0 }
0x1b81   :  { %v2607_v55 = vadd.f32 %v3653_v54, %v3200_v57 }
0x1b82   :  { %v2601_v56 = vpop.f32.mrf.mxu0 }
0x1b83   :  { %v2611_v58 = vadd.f32 %v2607_v55, %v4487_v10  ;;  %v2602_v59 = vadd.f32 %v3200_v57, %v2601_v56 }
0x1b85   :  { %v2619_v60 = vsel %vm191_vm2, %v2611_v58, 0.0  ;;  %v2610_v23 = vadd.f32 %v2602_v59, %v4482_v15  ;;  %v3214_v15 = vld [vmem:[%s4818_s12 + $0x78] sm:$0xff] }
0x1b86   :  { %2620 = vadd.xlane.f32.xlu0 %v2619_v60  ;;  %3654 = vmatprep.subr.mxu1 %v3214_v15 }
0x1b87   :  { %v2616_v29 = vsel %vm191_vm2, %v2610_v23, 0.0  ;;  %3655 = vmatpush3.msra.mxu1 %v3214_v15 }
0x1b88   :  { %2617 = vadd.xlane.f32.xlu1 %v2616_v29  ;;  %3656 = vmatprep.subr.mxu1 %v3213_v9 }
0x1b89   :  { %3657 = vmatpush3.msra.mxu1 %v3213_v9 }
0x1b8a   :  { %3658 = vmatprep.subr.mxu1 %v3212_v13 }
0x1b8b   :  { %3659 = vmatpush3.msra.mxu1 %v3212_v13  ;;  %v3236_v13 = vld [vmem:[%s4821_s15 + $0x1] ss:$0 sm:$0xff] }
0x1b8c   :  { %3660 = vmatprep.subr.mxu1 %v3211_v14 }
0x1b8d   :  { %3661 = vmatpush3.msra.mxu1 %v3211_v14 }
0x1b8e   :  { %3662 = vmatprep.subr.mxu1 %v3210_v17 }
0x1b8f   :  { %3663 = vmatpush3.msra.mxu1 %v3210_v17 }
0x1b90   :  { %3664 = vmatprep.subr.mxu1 %v3209_v7 }
0x1b91   :  { %3665 = vmatpush3.msra.mxu1 %v3209_v7 }
0x1b92   :  { %3666 = vmatprep.subr.mxu1 %v3208_v18 }
0x1b93   :  { %3667 = vmatpush3.msra.mxu1 %v3208_v18 }
0x1b94   :  { %3668 = vmatprep.subr.mxu1 %v3207_v22 }
0x1b95   :  { %3669 = vmatpush3.msra.mxu1 %v3207_v22 }
0x1b96   :  { %3708 = vmatprep.subr.mxu1 %v3893_v47 }
0x1c0f   :  { %v2621_v62 = vpop.xlane.xlu0 %2620 }
0x1c10   :  { %v2623_v0 = vmul.f32 0.015625, %v2621_v62 }
0x1c11   :  { %v2618_v1 = vpop.xlane.xlu1 %2617 }
0x1c12   :  { %v2625_v2 = vsub.f32 %v2611_v58, %v2623_v0  ;;  %v2622_v3 = vmul.f32 0.015625, %v2618_v1 }
0x1c14   :  { %v2624_v4 = vsub.f32 %v2610_v23, %v2622_v3  ;;  %v2627_v5 = vmul.f32 %v2625_v2, %v2625_v2 }
0x1c16   :  { %v2631_v6 = vsel %vm191_vm2, %v2627_v5, 0.0  ;;  %v2626_v8 = vmul.f32 %v2624_v4, %v2624_v4 }
0x1c17   :  { %2632 = vadd.xlane.f32.xlu1 %v2631_v6 }
0x1c18   :  { %v2628_v10 = vsel %vm191_vm2, %v2626_v8, 0.0 }
0x1c19   :  { %2629 = vadd.xlane.f32.xlu0 %v2628_v10 }
0x1ca0   :  { %v2633_v24 = vpop.xlane.xlu1 %2632 }
0x1ca1   :  { %v2635_v63 = vmul.f32 0.015625, %v2633_v24 }
0x1ca2   :  { %v2630_v25 = vpop.xlane.xlu0 %2629 }
0x1ca3   :  { %v2637_v61 = vadd.f32 1e-12, %v2635_v63  ;;  %v2634_v31 = vmul.f32 0.015625, %v2630_v25 }
0x1ca5   :  { %3830 = vrsqrt.f32 %v2637_v61  ;;  %v2636_v12 = vadd.f32 1e-12, %v2634_v31 }
0x1ca7   :  { %3832 = vrsqrt.f32 %v2636_v12 }
0x1cb2   :  { %v3831_v32 = vpop.eup %3830 }
0x1cb3   :  { %v2641_v33 = vmul.f32 %v3831_v32, %v2625_v2 }
0x1cb4   :  { %v3833_v21 = vpop.eup %3832 }
0x1cb5   :  { %v2640_v34 = vmul.f32 %v3833_v21, %v2624_v4  ;;  %v2649_v27 = vmul.f32 %v3205_v35, %v2641_v33 }
0x1cb7   :  { %v2648_v37 = vmul.f32 %v3205_v35, %v2640_v34  ;;  %v4710_v38 = vadd.f32 %v3206_v36, %v2649_v27 }
0x1cb9   :  { %v4708_v26 = vadd.f32 %v3206_v36, %v2648_v37 }
0x1cbb   :  { %3670 = vmatprep.mubr.msk.f32.mxu1 %vm191_vm2, %v4708_v26 }
0x1cbc   :  { %3671 = vmatmul.mubr.msk.f32.vlgmr.msra.gmra.mxu1 %vm191_vm2, %v4710_v38 }
0x1cbd   :  { %3712 = vmatprep.mubr.msk.f32.mxu1 %vm3901_vm6, %v3893_v47 }
0x1d7c   :  { %v3672_v53 = vpop.f32.mrf.mxu1 }
0x1d7d   :  { %v2753_v57 = vadd.f32 %v3672_v53, %v3216_v52  ;;  %v3004_v53 = vld [vmem:[#allocation2 + $0x18] sm:$0xff] }
0x1d7e   :  { %v2747_v54 = vpop.f32.mrf.mxu1 }
0x1d7f   :  { %v2757_v55 = vmul.f32 %v2753_v57, %v2753_v57  ;;  %v2748_v56 = vadd.f32 %v3216_v52, %v2747_v54  ;;  %v3005_v52 = vld [vmem:[#allocation2 + $0x20] sm:$0xff]  ;;  %v3002_v54 = vld [vmem:[#allocation2 + $0x8] sm:$0xff] }
0x1d81   :  { %v2759_v58 = vmul.f32 %v2757_v55, %v2753_v57  ;;  %v2756_v59 = vmul.f32 %v2748_v56, %v2748_v56  ;;  %v3001_v55 = vld [vmem:[#allocation2] sm:$0xff] }
0x1d83   :  { %v2761_v60 = vmul.f32 0.044715, %v2759_v58  ;;  %v2758_v23 = vmul.f32 %v2756_v59, %v2748_v56  ;;  %v3243_v59 = vld [vmem:[%s4825_s19] ss:$0 sm:$0xff] }
0x1d85   :  { %v2763_v29 = vadd.f32 %v2761_v60, %v2753_v57  ;;  %v2760_v62 = vmul.f32 0.044715, %v2758_v23 }
0x1d87   :  { %v2765_v0 = vmul.f32 0.7978846, %v2763_v29  ;;  %v2762_v1 = vadd.f32 %v2760_v62, %v2748_v56 }
0x1d89   :  { %3834 = vtanh.f32 %v2765_v0  ;;  %v2764_v2 = vmul.f32 0.7978846, %v2762_v1 }
0x1d8b   :  { %3836 = vtanh.f32 %v2764_v2 }
0x1d96   :  { %v3835_v3 = vpop.eup %3834 }
0x1d97   :  { %v2769_v4 = vadd.f32 1.0, %v3835_v3 }
0x1d98   :  { %v3837_v5 = vpop.eup %3836 }
0x1d99   :  { %v2768_v6 = vadd.f32 1.0, %v3837_v5  ;;  %v2771_v8 = vmul.f32 0.5, %v2769_v4 }
0x1d9b   :  { %v2770_v10 = vmul.f32 0.5, %v2768_v6  ;;  %v2773_v9 = vmul.f32 %v2771_v8, %v2753_v57  ;;  %v3003_v57 = vld [vmem:[#allocation2 + $0x10] sm:$0xff] }
0x1d9d   :  { %v2772_v15 = vmul.f32 %v2770_v10, %v2748_v56 }
0x1d9f   :  { %3705 = vmatprep.mubr.f32.mxu0 %v2772_v15 }
0x1da0   :  { %3706 = vmatmul.mubr.f32.vlgmr.msra.gmra.mxu0 %v2773_v9 }
0x1e60   :  { %v3707_v14 = vpop.f32.mrf.mxu0 }
0x1e61   :  { %v2871_v17 = vadd.f32 %v3707_v14, %v3236_v13 }
0x1e62   :  { %v2865_v7 = vpop.f32.mrf.mxu0 }
0x1e63   :  { %v2875_v18 = vadd.f32 %v2871_v17, %v4710_v38  ;;  %v2866_v22 = vadd.f32 %v3236_v13, %v2865_v7 }
0x1e65   :  { %v2874_v24 = vadd.f32 %v2866_v22, %v4708_v26  ;;  %v2883_v63 = vsel %vm191_vm2, %v2875_v18, 0.0 }
0x1e66   :  { %2884 = vadd.xlane.f32.xlu0 %v2883_v63 }
0x1e67   :  { %v2880_v25 = vsel %vm191_vm2, %v2874_v24, 0.0 }
0x1e68   :  { %2881 = vadd.xlane.f32.xlu1 %v2880_v25 }
0x1eef   :  { %v2885_v61 = vpop.xlane.xlu0 %2884 }
0x1ef0   :  { %v2887_v31 = vmul.f32 0.015625, %v2885_v61 }
0x1ef1   :  { %v2882_v12 = vpop.xlane.xlu1 %2881 }
0x1ef2   :  { %v2889_v32 = vsub.f32 %v2875_v18, %v2887_v31  ;;  %v2886_v35 = vmul.f32 0.015625, %v2882_v12 }
0x1ef4   :  { %v2888_v33 = vsub.f32 %v2874_v24, %v2886_v35  ;;  %v2891_v21 = vmul.f32 %v2889_v32, %v2889_v32 }
0x1ef6   :  { %v2895_v34 = vsel %vm191_vm2, %v2891_v21, 0.0  ;;  %v2890_v27 = vmul.f32 %v2888_v33, %v2888_v33 }
0x1ef7   :  { %2896 = vadd.xlane.f32.xlu0 %v2895_v34 }
0x1ef8   :  { %v2892_v36 = vsel %vm191_vm2, %v2890_v27, 0.0 }
0x1ef9   :  { %2893 = vadd.xlane.f32.xlu1 %v2892_v36 }
0x1f80   :  { %v2897_v37 = vpop.xlane.xlu0 %2896 }
0x1f81   :  { %v2899_v26 = vmul.f32 0.015625, %v2897_v37 }
0x1f82   :  { %v2894_v38 = vpop.xlane.xlu1 %2893 }
0x1f83   :  { %v2901_v39 = vadd.f32 1e-12, %v2899_v26  ;;  %v2898_v40 = vmul.f32 0.015625, %v2894_v38 }
0x1f85   :  { %3838 = vrsqrt.f32 %v2901_v39  ;;  %v2900_v41 = vadd.f32 1e-12, %v2898_v40 }
0x1f87   :  { %3840 = vrsqrt.f32 %v2900_v41 }
0x1f92   :  { %v3839_v42 = vpop.eup %3838 }
0x1f93   :  { %v2905_v48 = vmul.f32 %v3839_v42, %v2889_v32 }
0x1f94   :  { %v3841_v28 = vpop.eup %3840 }
0x1f95   :  { %v2913_v30 = vmul.f32 %v3239_v43, %v2905_v48  ;;  %v2904_v44 = vmul.f32 %v3841_v28, %v2888_v33 }
0x1f97   :  { %v2921_v49 = vadd.f32 %v3240_v45, %v2913_v30  ;;  %v2912_v50 = vmul.f32 %v3239_v43, %v2904_v44 }
0x1f99   :  { %3709 = vmatpush3.msra.mxu1 %v2921_v49  ;;  %v2920_v16 = vadd.f32 %v3240_v45, %v2912_v50 }
0x1f9a   :  { %3710 = vmatprep.subr.mxu1 %v3893_v47 }
0x1f9b   :  { %3711 = vmatpush3.msra.mxu1 %v2920_v16 }
0x1f9c   :  { %3713 = vmatmul.mubr.msk.f32.vlgmr.msra.gmra.mxu1 %vm354_vm3, %v3241_v51  ;;  %3715 = vmatprep.subr.mxu1 %v3893_v47 }
0x1f9d   :  { %3716 = vmatpush3.msra.mxu1 %v3008_v19  ;;  %3731 = vmatprep.mubr.msk.f32.mxu1 %vm3901_vm6, %v3893_v47 }
0x1f9e   :  { %3717 = vmatprep.subr.mxu1 %v3893_v47 }
0x1f9f   :  { %3718 = vmatpush3.msra.mxu1 %v3007_v11 }
0x1fa0   :  { %3719 = vmatprep.subr.mxu1 %v3893_v47 }
0x1fa1   :  { %3720 = vmatpush3.msra.mxu1 %v3006_v20 }
0x1fa2   :  { %3721 = vmatprep.subr.mxu1 %v3893_v47 }
0x1fa3   :  { %3722 = vmatpush3.msra.mxu1 %v3005_v52 }
0x1fa4   :  { %3723 = vmatprep.subr.mxu1 %v3893_v47 }
0x1fa5   :  { %3724 = vmatpush3.msra.mxu1 %v3004_v53 }
0x1fa6   :  { %3725 = vmatprep.subr.mxu1 %v3893_v47 }
0x1fa7   :  { %3726 = vmatpush3.msra.mxu1 %v3003_v57 }
0x1fa8   :  { %3727 = vmatprep.subr.mxu1 %v3893_v47 }
0x1fa9   :  { %3728 = vmatpush3.msra.mxu1 %v3002_v54 }
0x1faa   :  { %3729 = vmatprep.subr.mxu1 %v3893_v47 }
0x1fab   :  { %3730 = vmatpush3.msra.mxu1 %v3001_v55 }
0x205c   :  { %v2997_v56 = vpop.f32.mrf.mxu1 }
0x205d   :  { %3732 = vmatmul.mubr.msk.f32.vlgmr.msra.gmra.mxu1 %vm191_vm2, %v2997_v56 }
0x205e   :  { %v3714_v58 = vpop.f32.mrf.mxu1 }
0x211d   :  { %v3085_v60 = vpop.f32.mrf.mxu1 }
0x211e   :  { %v3086_v23 = vadd.f32 %v3243_v59, %v3085_v60 }
0x211f   :  { %v3733_v29 = vpop.f32.mrf.mxu1 }
0x2120   :  { %3089 = vst [vmem:[#allocation5] sm:$0x3] %v3086_v23 }
0x2121   :  { %3875 = shalt.err (!%p3872_p9)
}
0x2122   :  { %3099 = dma.vmem_to_hbm [thread:$0]  %s3097_s27, 32, %s4826_s20, [#allocation4]  }
0x2123   :  { %3886 = dma.done.wait [#allocation4], 32  }
0x2124   :  { %3887 = vsyncadd [#allocation4], 4294967264 }
0x2125   :  { %3103 = vsyncpa [#allocation3], 1 }
0x2126   :  { %3104 = vsyncpa [#allocation4], 1 }

</bundles_post_ra>
